<compile_context>
chip_gen: v6e
topology: v6e:2x2x1
jax: 0.10.0
libtpu: 0.0.40
codegen_flags: <defaults>
</compile_context>

<pallas_src>
import functools

import jax
import jax.numpy as jnp
from jax import lax
from jax.experimental import pallas as pl
from jax.experimental.pallas import tpu as pltpu


def _sigmoid(x):
    # sigmoid(x) = 0.5 * tanh(x/2) + 0.5 — a single EUP op per element
    # (vs. exp + divide), keeping the EUP slot light on the serial path.
    return 0.5 * jnp.tanh(0.5 * x) + 0.5


def lstm_recurrence_kernel(gx_ref, w_hh_ref, h_out_ref, c_out_ref,
                           h_scr, c_scr, *, unroll):
    """One (batch block, time block) grid step of the LSTM recurrence.

    gx_ref   : (Tb, Bb, 4Hp) precomputed x_t @ W_ih^T + b_ih + b_hh, time-major
               (dtype = mxu_dtype, possibly bf16)
    w_hh_ref : (Hp, 4Hp)     recurrent weights (transposed), VMEM-resident
    h_out_ref, c_out_ref : (Bb, Hp) final state (written only on last time block)
    h_scr, c_scr : (Bb, Hp) f32 VMEM scratch carrying state across the
               "arbitrary" time grid axis.
    """
    t_blk = pl.program_id(1)

    @pl.when(t_blk == 0)
    def _init():
        h_scr[...] = jnp.zeros_like(h_scr)
        c_scr[...] = jnp.zeros_like(c_scr)

    Tb = gx_ref.shape[0]
    G = gx_ref.shape[2]
    H = G // 4

    w_hh = w_hh_ref[...]          # loop-invariant VMEM operand (streamed by MXU)

    def step(tau, carry):
        h_prev, c_prev = carry
        # Only this (Bb,Hp)x(Hp,4Hp) MXU push sits on the serial critical path.
        rec = jnp.dot(h_prev.astype(w_hh.dtype), w_hh,
                      preferred_element_type=jnp.float32)        # (Bb, 4Hp) f32
        gates = gx_ref[tau].astype(jnp.float32) + rec
        # PyTorch gate order [i, f, g, o]; Hp is a multiple of 128 so every gate
        # slice is lane-aligned (no cross-lane relayout per step).
        i_g = _sigmoid(gates[:, 0 * H:1 * H])
        f_g = _sigmoid(gates[:, 1 * H:2 * H])
        g_g = jnp.tanh(gates[:, 2 * H:3 * H])
        o_g = _sigmoid(gates[:, 3 * H:4 * H])
        # Cell/hidden update kept in f32 (drift control; v5e has no bf16 VPU/EUP).
        c_new = f_g * c_prev + i_g * g_g
        h_new = o_g * jnp.tanh(c_new)
        return h_new, c_new

    # Partial unroll only — full unroll of long T explodes code size / spills.
    h_f, c_f = lax.fori_loop(0, Tb, step, (h_scr[...], c_scr[...]),
                             unroll=unroll)
    h_scr[...] = h_f
    c_scr[...] = c_f

    @pl.when(t_blk == pl.num_programs(1) - 1)
    def _finalize():
        h_out_ref[...] = h_f.astype(h_out_ref.dtype)
        c_out_ref[...] = c_f.astype(c_out_ref.dtype)


def _round_up(x, m):
    return ((x + m - 1) // m) * m


def _pad_axis(a, axis, new_size):
    if a.shape[axis] == new_size:
        return a
    pad = [(0, 0)] * a.ndim
    pad[axis] = (0, new_size - a.shape[axis])
    return jnp.pad(a, pad)


def encoder_forward(x, w_ih, w_hh, b_ih, b_hh, *,
                    batch_block=None, time_block=None,
                    mxu_dtype=jnp.float32, unroll=8):
    """Pallas equivalent of Encoder.forward(x) -> (hidden, cell).

    x     : (B, T, D_in) float32 (PyTorch batch_first layout)
    w_ih  : (4H, D_in), w_hh: (4H, H), b_ih/b_hh: (4H,)  (PyTorch param layout)
    returns hidden, cell each of shape (1, B, H)

    mxu_dtype : dtype of the matmul operands (gx, W_hh, h at the dot).
                bf16 recommended on v6e/v7x; accumulation and state stay f32.
    """
    B, T, D = x.shape
    H = w_hh.shape[1]
    assert w_ih.shape == (4 * H, D)

    # ---- padding so gate slices and output stores are lane/sublane aligned ----
    Hp = _round_up(H, 128)                                     # lane-dense
    is_bf16 = jnp.dtype(mxu_dtype) == jnp.dtype(jnp.bfloat16)
    sub = 16 if is_bf16 else 8                                 # sublane tile
    if batch_block is None:
        # Only split the batch across the parallel grid when explicitly asked;
        # splitting a modest B just starves the MXU on the serial recurrence.
        Bp = _round_up(B, sub)
        Bb = Bp
    else:
        assert batch_block % sub == 0
        Bp = _round_up(B, batch_block)
        Bb = batch_block

    if time_block is None:
        Tb = T
        for cand in (64, 32, 16, 8):
            if cand < T and T % cand == 0:
                Tb = cand
                break
    else:
        assert T % time_block == 0, "time_block must divide T (no time padding)"
        Tb = time_block

    # Gate-blockwise parameter padding [i,f,g,o]: each gate's H is padded to Hp
    # with zeros, so padded hidden units stay exactly zero and real outputs are
    # identical to the unpadded computation.
    w_ih_p = _pad_axis(w_ih.reshape(4, H, D), 1, Hp).reshape(4 * Hp, D)
    w_hh_p = _pad_axis(_pad_axis(w_hh.reshape(4, H, H), 1, Hp), 2, Hp)
    w_hh_p = w_hh_p.reshape(4 * Hp, Hp)
    b_p = _pad_axis((b_ih + b_hh).reshape(4, H), 1, Hp).reshape(4 * Hp)

    # ---- hoisted input projection: one big matmul for all timesteps ----
    # Pre-transpose x once (small: B*T*D) so gx comes out time-major directly —
    # no transpose pass over the large (T, Bp, 4Hp) tensor.
    x_tm = jnp.transpose(_pad_axis(x, 0, Bp), (1, 0, 2))       # (T, Bp, D)
    gx = (jnp.dot(x_tm.reshape(T * Bp, D), w_ih_p.T,
                  preferred_element_type=jnp.float32)
          + b_p).reshape(T, Bp, 4 * Hp)
    gx = gx.astype(mxu_dtype)                  # bf16 halves gx HBM traffic/VMEM
    w_hh_t = jnp.transpose(w_hh_p).astype(mxu_dtype)           # (Hp, 4Hp)

    grid = (Bp // Bb, T // Tb)                 # (parallel batch, arbitrary time)

    # Explicit VMEM budget: gx double-buffered + W_hh + outputs + scratch.
    # Sized so a v7x (64 MiB VMEM, 32 MiB default scoped limit) never OOMs.
    item = jnp.dtype(mxu_dtype).itemsize
    vmem_needed = (2 * Tb * Bb * 4 * Hp * item          # gx blocks (dbl-buffer)
                   + 2 * Hp * 4 * Hp * item             # W_hh^T
                   + 4 * Bb * Hp * 4                    # h/c outputs (dbl-buffer)
                   + 2 * Bb * Hp * 4                    # h/c scratch
                   + (4 << 20))                         # slack
    vmem_limit = int(min(max(vmem_needed, 16 << 20), 64 << 20))

    kernel = functools.partial(lstm_recurrence_kernel, unroll=min(unroll, Tb))

    h_pad, c_pad = pl.pallas_call(
        kernel,
        out_shape=(jax.ShapeDtypeStruct((Bp, Hp), x.dtype),
                   jax.ShapeDtypeStruct((Bp, Hp), x.dtype)),
        grid=grid,
        in_specs=[
            pl.BlockSpec((Tb, Bb, 4 * Hp), lambda b, t: (t, b, 0)),  # gx T-tile
            pl.BlockSpec((Hp, 4 * Hp), lambda b, t: (0, 0)),         # W_hh^T
        ],
        out_specs=(pl.BlockSpec((Bb, Hp), lambda b, t: (b, 0)),
                   pl.BlockSpec((Bb, Hp), lambda b, t: (b, 0))),
        scratch_shapes=[pltpu.VMEM((Bb, Hp), jnp.float32),   # h carry
                        pltpu.VMEM((Bb, Hp), jnp.float32)],  # c carry
        compiler_params=pltpu.CompilerParams(
            dimension_semantics=("parallel", "arbitrary"),
            vmem_limit_bytes=vmem_limit),
    )(gx, w_hh_t)

    h = h_pad[:B, :H]
    c = c_pad[:B, :H]
    return h[None, ...], c[None, ...]   # (1, B, H) like PyTorch (num_layers, B, H)


def encoder_reference(x, w_ih, w_hh, b_ih, b_hh):
    """Pure-JAX reference matching torch.nn.LSTM (1 layer, batch_first)."""
    B, T, D = x.shape
    H = w_hh.shape[1]

    def step(carry, x_t):
        h_prev, c_prev = carry
        gates = x_t @ w_ih.T + h_prev @ w_hh.T + b_ih + b_hh
        i_g = jax.nn.sigmoid(gates[:, 0 * H:1 * H])
        f_g = jax.nn.sigmoid(gates[:, 1 * H:2 * H])
        g_g = jnp.tanh(gates[:, 2 * H:3 * H])
        o_g = jax.nn.sigmoid(gates[:, 3 * H:4 * H])
        c_new = f_g * c_prev + i_g * g_g
        h_new = o_g * jnp.tanh(c_new)
        return (h_new, c_new), None

    h0 = jnp.zeros((B, H), x.dtype)
    c0 = jnp.zeros((B, H), x.dtype)
    (h_f, c_f), _ = lax.scan(step, (h0, c0), jnp.transpose(x, (1, 0, 2)))
    return h_f[None, ...], c_f[None, ...]


if __name__ == "__main__":
    # Small shapes consistent with the module: batch=2, input_dim=16, hidden=32.
    # T=16 with time_block=8 exercises the carried-state / multi-time-block path.
    B, T, D_in, H = 2, 16, 16, 32

    key = jax.random.PRNGKey(0)
    kx, kp = jax.random.split(key)
    x = jax.random.normal(kx, (B, T, D_in), dtype=jnp.float32)

    # Deterministic parameter init, PyTorch-style U(-1/sqrt(H), 1/sqrt(H)).
    k = 1.0 / jnp.sqrt(jnp.float32(H))
    k1, k2, k3, k4 = jax.random.split(kp, 4)
    w_ih = jax.random.uniform(k1, (4 * H, D_in), jnp.float32, -k, k)
    w_hh = jax.random.uniform(k2, (4 * H, H), jnp.float32, -k, k)
    b_ih = jax.random.uniform(k3, (4 * H,), jnp.float32, -k, k)
    b_hh = jax.random.uniform(k4, (4 * H,), jnp.float32, -k, k)

    h_ref, c_ref = encoder_reference(x, w_ih, w_hh, b_ih, b_hh)

    # f32 MXU-operand path (tight numerical check).
    fwd_f32 = jax.jit(functools.partial(encoder_forward, time_block=8))
    hidden, cell = fwd_f32(x, w_ih, w_hh, b_ih, b_hh)
    jax.block_until_ready((hidden, cell))
    assert hidden.shape == (1, B, H) and cell.shape == (1, B, H)
    assert jnp.allclose(hidden, h_ref, atol=5e-5, rtol=5e-5)
    assert jnp.allclose(cell, c_ref, atol=5e-5, rtol=5e-5)

    # bf16 MXU-operand path (production setting on v6e/v7x): f32 accumulation,
    # f32 state — looser tolerance from bf16-rounded gx / W_hh operands.
    fwd_bf16 = jax.jit(functools.partial(encoder_forward, time_block=8,
                                         mxu_dtype=jnp.bfloat16))
    hidden_b, cell_b = fwd_bf16(x, w_ih, w_hh, b_ih, b_hh)
    jax.block_until_ready((hidden_b, cell_b))
    assert jnp.allclose(hidden_b, h_ref, atol=5e-2, rtol=5e-2)
    assert jnp.allclose(cell_b, c_ref, atol=5e-2, rtol=5e-2)

    print("KERNEL_OK")
</pallas_src>

<mosaic_0001>
module attributes {stable_mosaic.version = 11 : i64} {
  func.func @lstm_recurrence_kernel(%arg0: i32, %arg1: i32, %arg2: memref<8x8x512xf32, #tpu.memory_space<vmem>>, %arg3: memref<128x512xf32, #tpu.memory_space<vmem>>, %arg4: memref<8x128xf32, #tpu.memory_space<vmem>>, %arg5: memref<8x128xf32, #tpu.memory_space<vmem>>, %arg6: memref<8x128xf32, #tpu.memory_space<vmem>>, %arg7: memref<8x128xf32, #tpu.memory_space<vmem>>) attributes {dimension_semantics = [#tpu.dimension_semantics<parallel>, #tpu.dimension_semantics<arbitrary>], iteration_bounds = array<i64: 1, 2>, scalar_prefetch = 0 : i64, scratch_operands = 2 : i64, tpu.core_type = #tpu.core_type<tc>, window_params = [{transform_indices = @transform_0, window_bounds = array<i64: 8, 8, 512>}, {pipeline_mode = #tpu.pipeline_mode<synchronous>, transform_indices = @transform_1, window_bounds = array<i64: 128, 512>}, {transform_indices = @transform_2, window_bounds = array<i64: 8, 128>}, {transform_indices = @transform_3, window_bounds = array<i64: 8, 128>}]} {
    %c0_i32 = arith.constant 0 : i32
    %0 = arith.cmpi eq, %arg1, %c0_i32 : i32
    %1 = arith.extui %0 : i1 to i32
    %c0_i32_0 = arith.constant 0 : i32
    %2 = arith.cmpi ne, %1, %c0_i32_0 : i32
    scf.if %2 {
      %cst_108 = arith.constant 0.000000e+00 : f32
      %299 = vector.broadcast %cst_108 : f32 to vector<8x128xf32>
      %c0_109 = arith.constant 0 : index
      %c0_110 = arith.constant 0 : index
      %300 = vector.load %arg6[%c0_109, %c0_110] : memref<8x128xf32, #tpu.memory_space<vmem>>, vector<8x128xf32>
      tpu.vector_store %arg6[%c0_109, %c0_110], %299 {strides = array<i32>} : memref<8x128xf32, #tpu.memory_space<vmem>>, vector<8x128xf32>,
      %cst_111 = arith.constant 0.000000e+00 : f32
      %301 = vector.broadcast %cst_111 : f32 to vector<8x128xf32>
      %c0_112 = arith.constant 0 : index
      %c0_113 = arith.constant 0 : index
      %302 = vector.load %arg7[%c0_112, %c0_113] : memref<8x128xf32, #tpu.memory_space<vmem>>, vector<8x128xf32>
      tpu.vector_store %arg7[%c0_112, %c0_113], %301 {strides = array<i32>} : memref<8x128xf32, #tpu.memory_space<vmem>>, vector<8x128xf32>,
    } else {
    }
    %c0 = arith.constant 0 : index
    %c0_1 = arith.constant 0 : index
    %3 = vector.load %arg3[%c0, %c0_1] : memref<128x512xf32, #tpu.memory_space<vmem>>, vector<128x512xf32>
    %c0_2 = arith.constant 0 : index
    %c0_3 = arith.constant 0 : index
    %4 = vector.load %arg6[%c0_2, %c0_3] : memref<8x128xf32, #tpu.memory_space<vmem>>, vector<8x128xf32>
    %c0_4 = arith.constant 0 : index
    %c0_5 = arith.constant 0 : index
    %5 = vector.load %arg7[%c0_4, %c0_5] : memref<8x128xf32, #tpu.memory_space<vmem>>, vector<8x128xf32>
    %c0_i32_6 = arith.constant 0 : i32
    %cst = arith.constant dense<0.000000e+00> : vector<8x512xf32>
    %6 = tpu.matmul %4, %3, %cst {dimension_numbers = #tpu.dot_dimension_numbers<[1], [0], [0], [1], [0, 0, 1, 1], [], []>} : vector<8x128xf32>, vector<128x512xf32>, vector<8x512xf32> -> vector<8x512xf32>
    %7 = arith.index_cast %c0_i32_6 : i32 to index
    %c0_7 = arith.constant 0 : index
    %c0_8 = arith.constant 0 : index
    %8 = vector.load %arg2[%7, %c0_7, %c0_8] : memref<8x8x512xf32, #tpu.memory_space<vmem>>, vector<1x8x512xf32>
    %9 = vector.shape_cast %8 : vector<1x8x512xf32> to vector<8x512xf32>
    %10 = arith.addf %9, %6 : vector<8x512xf32>
    %11 = vector.extract_strided_slice %10 {offsets = [0, 0], sizes = [8, 128], strides = [1, 1]} : vector<8x512xf32> to vector<8x128xf32>
    %cst_9 = arith.constant 5.000000e-01 : f32
    %12 = vector.broadcast %cst_9 : f32 to vector<8x128xf32>
    %13 = arith.mulf %12, %11 : vector<8x128xf32>
    %14 = math.tanh %13 : vector<8x128xf32>
    %cst_10 = arith.constant 5.000000e-01 : f32
    %15 = vector.broadcast %cst_10 : f32 to vector<8x128xf32>
    %16 = arith.mulf %15, %14 : vector<8x128xf32>
    %cst_11 = arith.constant 5.000000e-01 : f32
    %17 = vector.broadcast %cst_11 : f32 to vector<8x128xf32>
    %18 = arith.addf %16, %17 : vector<8x128xf32>
    %19 = vector.extract_strided_slice %10 {offsets = [0, 128], sizes = [8, 128], strides = [1, 1]} : vector<8x512xf32> to vector<8x128xf32>
    %cst_12 = arith.constant 5.000000e-01 : f32
    %20 = vector.broadcast %cst_12 : f32 to vector<8x128xf32>
    %21 = arith.mulf %20, %19 : vector<8x128xf32>
    %22 = math.tanh %21 : vector<8x128xf32>
    %cst_13 = arith.constant 5.000000e-01 : f32
    %23 = vector.broadcast %cst_13 : f32 to vector<8x128xf32>
    %24 = arith.mulf %23, %22 : vector<8x128xf32>
    %cst_14 = arith.constant 5.000000e-01 : f32
    %25 = vector.broadcast %cst_14 : f32 to vector<8x128xf32>
    %26 = arith.addf %24, %25 : vector<8x128xf32>
    %27 = vector.extract_strided_slice %10 {offsets = [0, 256], sizes = [8, 128], strides = [1, 1]} : vector<8x512xf32> to vector<8x128xf32>
    %28 = math.tanh %27 : vector<8x128xf32>
    %29 = vector.extract_strided_slice %10 {offsets = [0, 384], sizes = [8, 128], strides = [1, 1]} : vector<8x512xf32> to vector<8x128xf32>
    %cst_15 = arith.constant 5.000000e-01 : f32
    %30 = vector.broadcast %cst_15 : f32 to vector<8x128xf32>
    %31 = arith.mulf %30, %29 : vector<8x128xf32>
    %32 = math.tanh %31 : vector<8x128xf32>
    %cst_16 = arith.constant 5.000000e-01 : f32
    %33 = vector.broadcast %cst_16 : f32 to vector<8x128xf32>
    %34 = arith.mulf %33, %32 : vector<8x128xf32>
    %cst_17 = arith.constant 5.000000e-01 : f32
    %35 = vector.broadcast %cst_17 : f32 to vector<8x128xf32>
    %36 = arith.addf %34, %35 : vector<8x128xf32>
    %37 = arith.mulf %26, %5 : vector<8x128xf32>
    %38 = arith.mulf %18, %28 : vector<8x128xf32>
    %39 = arith.addf %37, %38 : vector<8x128xf32>
    %40 = math.tanh %39 : vector<8x128xf32>
    %41 = arith.mulf %36, %40 : vector<8x128xf32>
    %c1_i32 = arith.constant 1 : i32
    %cst_18 = arith.constant dense<0.000000e+00> : vector<8x512xf32>
    %42 = tpu.matmul %41, %3, %cst_18 {dimension_numbers = #tpu.dot_dimension_numbers<[1], [0], [0], [1], [0, 0, 1, 1], [], []>} : vector<8x128xf32>, vector<128x512xf32>, vector<8x512xf32> -> vector<8x512xf32>
    %43 = arith.index_cast %c1_i32 : i32 to index
    %c0_19 = arith.constant 0 : index
    %c0_20 = arith.constant 0 : index
    %44 = vector.load %arg2[%43, %c0_19, %c0_20] : memref<8x8x512xf32, #tpu.memory_space<vmem>>, vector<1x8x512xf32>
    %45 = vector.shape_cast %44 : vector<1x8x512xf32> to vector<8x512xf32>
    %46 = arith.addf %45, %42 : vector<8x512xf32>
    %47 = vector.extract_strided_slice %46 {offsets = [0, 0], sizes = [8, 128], strides = [1, 1]} : vector<8x512xf32> to vector<8x128xf32>
    %cst_21 = arith.constant 5.000000e-01 : f32
    %48 = vector.broadcast %cst_21 : f32 to vector<8x128xf32>
    %49 = arith.mulf %48, %47 : vector<8x128xf32>
    %50 = math.tanh %49 : vector<8x128xf32>
    %cst_22 = arith.constant 5.000000e-01 : f32
    %51 = vector.broadcast %cst_22 : f32 to vector<8x128xf32>
    %52 = arith.mulf %51, %50 : vector<8x128xf32>
    %cst_23 = arith.constant 5.000000e-01 : f32
    %53 = vector.broadcast %cst_23 : f32 to vector<8x128xf32>
    %54 = arith.addf %52, %53 : vector<8x128xf32>
    %55 = vector.extract_strided_slice %46 {offsets = [0, 128], sizes = [8, 128], strides = [1, 1]} : vector<8x512xf32> to vector<8x128xf32>
    %cst_24 = arith.constant 5.000000e-01 : f32
    %56 = vector.broadcast %cst_24 : f32 to vector<8x128xf32>
    %57 = arith.mulf %56, %55 : vector<8x128xf32>
    %58 = math.tanh %57 : vector<8x128xf32>
    %cst_25 = arith.constant 5.000000e-01 : f32
    %59 = vector.broadcast %cst_25 : f32 to vector<8x128xf32>
    %60 = arith.mulf %59, %58 : vector<8x128xf32>
    %cst_26 = arith.constant 5.000000e-01 : f32
    %61 = vector.broadcast %cst_26 : f32 to vector<8x128xf32>
    %62 = arith.addf %60, %61 : vector<8x128xf32>
    %63 = vector.extract_strided_slice %46 {offsets = [0, 256], sizes = [8, 128], strides = [1, 1]} : vector<8x512xf32> to vector<8x128xf32>
    %64 = math.tanh %63 : vector<8x128xf32>
    %65 = vector.extract_strided_slice %46 {offsets = [0, 384], sizes = [8, 128], strides = [1, 1]} : vector<8x512xf32> to vector<8x128xf32>
    %cst_27 = arith.constant 5.000000e-01 : f32
    %66 = vector.broadcast %cst_27 : f32 to vector<8x128xf32>
    %67 = arith.mulf %66, %65 : vector<8x128xf32>
    %68 = math.tanh %67 : vector<8x128xf32>
    %cst_28 = arith.constant 5.000000e-01 : f32
    %69 = vector.broadcast %cst_28 : f32 to vector<8x128xf32>
    %70 = arith.mulf %69, %68 : vector<8x128xf32>
    %cst_29 = arith.constant 5.000000e-01 : f32
    %71 = vector.broadcast %cst_29 : f32 to vector<8x128xf32>
    %72 = arith.addf %70, %71 : vector<8x128xf32>
    %73 = arith.mulf %62, %39 : vector<8x128xf32>
    %74 = arith.mulf %54, %64 : vector<8x128xf32>
    %75 = arith.addf %73, %74 : vector<8x128xf32>
    %76 = math.tanh %75 : vector<8x128xf32>
    %77 = arith.mulf %72, %76 : vector<8x128xf32>
    %c2_i32 = arith.constant 2 : i32
    %cst_30 = arith.constant dense<0.000000e+00> : vector<8x512xf32>
    %78 = tpu.matmul %77, %3, %cst_30 {dimension_numbers = #tpu.dot_dimension_numbers<[1], [0], [0], [1], [0, 0, 1, 1], [], []>} : vector<8x128xf32>, vector<128x512xf32>, vector<8x512xf32> -> vector<8x512xf32>
    %79 = arith.index_cast %c2_i32 : i32 to index
    %c0_31 = arith.constant 0 : index
    %c0_32 = arith.constant 0 : index
    %80 = vector.load %arg2[%79, %c0_31, %c0_32] : memref<8x8x512xf32, #tpu.memory_space<vmem>>, vector<1x8x512xf32>
    %81 = vector.shape_cast %80 : vector<1x8x512xf32> to vector<8x512xf32>
    %82 = arith.addf %81, %78 : vector<8x512xf32>
    %83 = vector.extract_strided_slice %82 {offsets = [0, 0], sizes = [8, 128], strides = [1, 1]} : vector<8x512xf32> to vector<8x128xf32>
    %cst_33 = arith.constant 5.000000e-01 : f32
    %84 = vector.broadcast %cst_33 : f32 to vector<8x128xf32>
    %85 = arith.mulf %84, %83 : vector<8x128xf32>
    %86 = math.tanh %85 : vector<8x128xf32>
    %cst_34 = arith.constant 5.000000e-01 : f32
    %87 = vector.broadcast %cst_34 : f32 to vector<8x128xf32>
    %88 = arith.mulf %87, %86 : vector<8x128xf32>
    %cst_35 = arith.constant 5.000000e-01 : f32
    %89 = vector.broadcast %cst_35 : f32 to vector<8x128xf32>
    %90 = arith.addf %88, %89 : vector<8x128xf32>
    %91 = vector.extract_strided_slice %82 {offsets = [0, 128], sizes = [8, 128], strides = [1, 1]} : vector<8x512xf32> to vector<8x128xf32>
    %cst_36 = arith.constant 5.000000e-01 : f32
    %92 = vector.broadcast %cst_36 : f32 to vector<8x128xf32>
    %93 = arith.mulf %92, %91 : vector<8x128xf32>
    %94 = math.tanh %93 : vector<8x128xf32>
    %cst_37 = arith.constant 5.000000e-01 : f32
    %95 = vector.broadcast %cst_37 : f32 to vector<8x128xf32>
    %96 = arith.mulf %95, %94 : vector<8x128xf32>
    %cst_38 = arith.constant 5.000000e-01 : f32
    %97 = vector.broadcast %cst_38 : f32 to vector<8x128xf32>
    %98 = arith.addf %96, %97 : vector<8x128xf32>
    %99 = vector.extract_strided_slice %82 {offsets = [0, 256], sizes = [8, 128], strides = [1, 1]} : vector<8x512xf32> to vector<8x128xf32>
    %100 = math.tanh %99 : vector<8x128xf32>
    %101 = vector.extract_strided_slice %82 {offsets = [0, 384], sizes = [8, 128], strides = [1, 1]} : vector<8x512xf32> to vector<8x128xf32>
    %cst_39 = arith.constant 5.000000e-01 : f32
    %102 = vector.broadcast %cst_39 : f32 to vector<8x128xf32>
    %103 = arith.mulf %102, %101 : vector<8x128xf32>
    %104 = math.tanh %103 : vector<8x128xf32>
    %cst_40 = arith.constant 5.000000e-01 : f32
    %105 = vector.broadcast %cst_40 : f32 to vector<8x128xf32>
    %106 = arith.mulf %105, %104 : vector<8x128xf32>
    %cst_41 = arith.constant 5.000000e-01 : f32
    %107 = vector.broadcast %cst_41 : f32 to vector<8x128xf32>
    %108 = arith.addf %106, %107 : vector<8x128xf32>
    %109 = arith.mulf %98, %75 : vector<8x128xf32>
    %110 = arith.mulf %90, %100 : vector<8x128xf32>
    %111 = arith.addf %109, %110 : vector<8x128xf32>
    %112 = math.tanh %111 : vector<8x128xf32>
    %113 = arith.mulf %108, %112 : vector<8x128xf32>
    %c3_i32 = arith.constant 3 : i32
    %cst_42 = arith.constant dense<0.000000e+00> : vector<8x512xf32>
    %114 = tpu.matmul %113, %3, %cst_42 {dimension_numbers = #tpu.dot_dimension_numbers<[1], [0], [0], [1], [0, 0, 1, 1], [], []>} : vector<8x128xf32>, vector<128x512xf32>, vector<8x512xf32> -> vector<8x512xf32>
    %115 = arith.index_cast %c3_i32 : i32 to index
    %c0_43 = arith.constant 0 : index
    %c0_44 = arith.constant 0 : index
    %116 = vector.load %arg2[%115, %c0_43, %c0_44] : memref<8x8x512xf32, #tpu.memory_space<vmem>>, vector<1x8x512xf32>
    %117 = vector.shape_cast %116 : vector<1x8x512xf32> to vector<8x512xf32>
    %118 = arith.addf %117, %114 : vector<8x512xf32>
    %119 = vector.extract_strided_slice %118 {offsets = [0, 0], sizes = [8, 128], strides = [1, 1]} : vector<8x512xf32> to vector<8x128xf32>
    %cst_45 = arith.constant 5.000000e-01 : f32
    %120 = vector.broadcast %cst_45 : f32 to vector<8x128xf32>
    %121 = arith.mulf %120, %119 : vector<8x128xf32>
    %122 = math.tanh %121 : vector<8x128xf32>
    %cst_46 = arith.constant 5.000000e-01 : f32
    %123 = vector.broadcast %cst_46 : f32 to vector<8x128xf32>
    %124 = arith.mulf %123, %122 : vector<8x128xf32>
    %cst_47 = arith.constant 5.000000e-01 : f32
    %125 = vector.broadcast %cst_47 : f32 to vector<8x128xf32>
    %126 = arith.addf %124, %125 : vector<8x128xf32>
    %127 = vector.extract_strided_slice %118 {offsets = [0, 128], sizes = [8, 128], strides = [1, 1]} : vector<8x512xf32> to vector<8x128xf32>
    %cst_48 = arith.constant 5.000000e-01 : f32
    %128 = vector.broadcast %cst_48 : f32 to vector<8x128xf32>
    %129 = arith.mulf %128, %127 : vector<8x128xf32>
    %130 = math.tanh %129 : vector<8x128xf32>
    %cst_49 = arith.constant 5.000000e-01 : f32
    %131 = vector.broadcast %cst_49 : f32 to vector<8x128xf32>
    %132 = arith.mulf %131, %130 : vector<8x128xf32>
    %cst_50 = arith.constant 5.000000e-01 : f32
    %133 = vector.broadcast %cst_50 : f32 to vector<8x128xf32>
    %134 = arith.addf %132, %133 : vector<8x128xf32>
    %135 = vector.extract_strided_slice %118 {offsets = [0, 256], sizes = [8, 128], strides = [1, 1]} : vector<8x512xf32> to vector<8x128xf32>
    %136 = math.tanh %135 : vector<8x128xf32>
    %137 = vector.extract_strided_slice %118 {offsets = [0, 384], sizes = [8, 128], strides = [1, 1]} : vector<8x512xf32> to vector<8x128xf32>
    %cst_51 = arith.constant 5.000000e-01 : f32
    %138 = vector.broadcast %cst_51 : f32 to vector<8x128xf32>
    %139 = arith.mulf %138, %137 : vector<8x128xf32>
    %140 = math.tanh %139 : vector<8x128xf32>
    %cst_52 = arith.constant 5.000000e-01 : f32
    %141 = vector.broadcast %cst_52 : f32 to vector<8x128xf32>
    %142 = arith.mulf %141, %140 : vector<8x128xf32>
    %cst_53 = arith.constant 5.000000e-01 : f32
    %143 = vector.broadcast %cst_53 : f32 to vector<8x128xf32>
    %144 = arith.addf %142, %143 : vector<8x128xf32>
    %145 = arith.mulf %134, %111 : vector<8x128xf32>
    %146 = arith.mulf %126, %136 : vector<8x128xf32>
    %147 = arith.addf %145, %146 : vector<8x128xf32>
    %148 = math.tanh %147 : vector<8x128xf32>
    %149 = arith.mulf %144, %148 : vector<8x128xf32>
    %c4_i32 = arith.constant 4 : i32
    %cst_54 = arith.constant dense<0.000000e+00> : vector<8x512xf32>
    %150 = tpu.matmul %149, %3, %cst_54 {dimension_numbers = #tpu.dot_dimension_numbers<[1], [0], [0], [1], [0, 0, 1, 1], [], []>} : vector<8x128xf32>, vector<128x512xf32>, vector<8x512xf32> -> vector<8x512xf32>
    %151 = arith.index_cast %c4_i32 : i32 to index
    %c0_55 = arith.constant 0 : index
    %c0_56 = arith.constant 0 : index
    %152 = vector.load %arg2[%151, %c0_55, %c0_56] : memref<8x8x512xf32, #tpu.memory_space<vmem>>, vector<1x8x512xf32>
    %153 = vector.shape_cast %152 : vector<1x8x512xf32> to vector<8x512xf32>
    %154 = arith.addf %153, %150 : vector<8x512xf32>
    %155 = vector.extract_strided_slice %154 {offsets = [0, 0], sizes = [8, 128], strides = [1, 1]} : vector<8x512xf32> to vector<8x128xf32>
    %cst_57 = arith.constant 5.000000e-01 : f32
    %156 = vector.broadcast %cst_57 : f32 to vector<8x128xf32>
    %157 = arith.mulf %156, %155 : vector<8x128xf32>
    %158 = math.tanh %157 : vector<8x128xf32>
    %cst_58 = arith.constant 5.000000e-01 : f32
    %159 = vector.broadcast %cst_58 : f32 to vector<8x128xf32>
    %160 = arith.mulf %159, %158 : vector<8x128xf32>
    %cst_59 = arith.constant 5.000000e-01 : f32
    %161 = vector.broadcast %cst_59 : f32 to vector<8x128xf32>
    %162 = arith.addf %160, %161 : vector<8x128xf32>
    %163 = vector.extract_strided_slice %154 {offsets = [0, 128], sizes = [8, 128], strides = [1, 1]} : vector<8x512xf32> to vector<8x128xf32>
    %cst_60 = arith.constant 5.000000e-01 : f32
    %164 = vector.broadcast %cst_60 : f32 to vector<8x128xf32>
    %165 = arith.mulf %164, %163 : vector<8x128xf32>
    %166 = math.tanh %165 : vector<8x128xf32>
    %cst_61 = arith.constant 5.000000e-01 : f32
    %167 = vector.broadcast %cst_61 : f32 to vector<8x128xf32>
    %168 = arith.mulf %167, %166 : vector<8x128xf32>
    %cst_62 = arith.constant 5.000000e-01 : f32
    %169 = vector.broadcast %cst_62 : f32 to vector<8x128xf32>
    %170 = arith.addf %168, %169 : vector<8x128xf32>
    %171 = vector.extract_strided_slice %154 {offsets = [0, 256], sizes = [8, 128], strides = [1, 1]} : vector<8x512xf32> to vector<8x128xf32>
    %172 = math.tanh %171 : vector<8x128xf32>
    %173 = vector.extract_strided_slice %154 {offsets = [0, 384], sizes = [8, 128], strides = [1, 1]} : vector<8x512xf32> to vector<8x128xf32>
    %cst_63 = arith.constant 5.000000e-01 : f32
    %174 = vector.broadcast %cst_63 : f32 to vector<8x128xf32>
    %175 = arith.mulf %174, %173 : vector<8x128xf32>
    %176 = math.tanh %175 : vector<8x128xf32>
    %cst_64 = arith.constant 5.000000e-01 : f32
    %177 = vector.broadcast %cst_64 : f32 to vector<8x128xf32>
    %178 = arith.mulf %177, %176 : vector<8x128xf32>
    %cst_65 = arith.constant 5.000000e-01 : f32
    %179 = vector.broadcast %cst_65 : f32 to vector<8x128xf32>
    %180 = arith.addf %178, %179 : vector<8x128xf32>
    %181 = arith.mulf %170, %147 : vector<8x128xf32>
    %182 = arith.mulf %162, %172 : vector<8x128xf32>
    %183 = arith.addf %181, %182 : vector<8x128xf32>
    %184 = math.tanh %183 : vector<8x128xf32>
    %185 = arith.mulf %180, %184 : vector<8x128xf32>
    %c5_i32 = arith.constant 5 : i32
    %cst_66 = arith.constant dense<0.000000e+00> : vector<8x512xf32>
    %186 = tpu.matmul %185, %3, %cst_66 {dimension_numbers = #tpu.dot_dimension_numbers<[1], [0], [0], [1], [0, 0, 1, 1], [], []>} : vector<8x128xf32>, vector<128x512xf32>, vector<8x512xf32> -> vector<8x512xf32>
    %187 = arith.index_cast %c5_i32 : i32 to index
    %c0_67 = arith.constant 0 : index
    %c0_68 = arith.constant 0 : index
    %188 = vector.load %arg2[%187, %c0_67, %c0_68] : memref<8x8x512xf32, #tpu.memory_space<vmem>>, vector<1x8x512xf32>
    %189 = vector.shape_cast %188 : vector<1x8x512xf32> to vector<8x512xf32>
    %190 = arith.addf %189, %186 : vector<8x512xf32>
    %191 = vector.extract_strided_slice %190 {offsets = [0, 0], sizes = [8, 128], strides = [1, 1]} : vector<8x512xf32> to vector<8x128xf32>
    %cst_69 = arith.constant 5.000000e-01 : f32
    %192 = vector.broadcast %cst_69 : f32 to vector<8x128xf32>
    %193 = arith.mulf %192, %191 : vector<8x128xf32>
    %194 = math.tanh %193 : vector<8x128xf32>
    %cst_70 = arith.constant 5.000000e-01 : f32
    %195 = vector.broadcast %cst_70 : f32 to vector<8x128xf32>
    %196 = arith.mulf %195, %194 : vector<8x128xf32>
    %cst_71 = arith.constant 5.000000e-01 : f32
    %197 = vector.broadcast %cst_71 : f32 to vector<8x128xf32>
    %198 = arith.addf %196, %197 : vector<8x128xf32>
    %199 = vector.extract_strided_slice %190 {offsets = [0, 128], sizes = [8, 128], strides = [1, 1]} : vector<8x512xf32> to vector<8x128xf32>
    %cst_72 = arith.constant 5.000000e-01 : f32
    %200 = vector.broadcast %cst_72 : f32 to vector<8x128xf32>
    %201 = arith.mulf %200, %199 : vector<8x128xf32>
    %202 = math.tanh %201 : vector<8x128xf32>
    %cst_73 = arith.constant 5.000000e-01 : f32
    %203 = vector.broadcast %cst_73 : f32 to vector<8x128xf32>
    %204 = arith.mulf %203, %202 : vector<8x128xf32>
    %cst_74 = arith.constant 5.000000e-01 : f32
    %205 = vector.broadcast %cst_74 : f32 to vector<8x128xf32>
    %206 = arith.addf %204, %205 : vector<8x128xf32>
    %207 = vector.extract_strided_slice %190 {offsets = [0, 256], sizes = [8, 128], strides = [1, 1]} : vector<8x512xf32> to vector<8x128xf32>
    %208 = math.tanh %207 : vector<8x128xf32>
    %209 = vector.extract_strided_slice %190 {offsets = [0, 384], sizes = [8, 128], strides = [1, 1]} : vector<8x512xf32> to vector<8x128xf32>
    %cst_75 = arith.constant 5.000000e-01 : f32
    %210 = vector.broadcast %cst_75 : f32 to vector<8x128xf32>
    %211 = arith.mulf %210, %209 : vector<8x128xf32>
    %212 = math.tanh %211 : vector<8x128xf32>
    %cst_76 = arith.constant 5.000000e-01 : f32
    %213 = vector.broadcast %cst_76 : f32 to vector<8x128xf32>
    %214 = arith.mulf %213, %212 : vector<8x128xf32>
    %cst_77 = arith.constant 5.000000e-01 : f32
    %215 = vector.broadcast %cst_77 : f32 to vector<8x128xf32>
    %216 = arith.addf %214, %215 : vector<8x128xf32>
    %217 = arith.mulf %206, %183 : vector<8x128xf32>
    %218 = arith.mulf %198, %208 : vector<8x128xf32>
    %219 = arith.addf %217, %218 : vector<8x128xf32>
    %220 = math.tanh %219 : vector<8x128xf32>
    %221 = arith.mulf %216, %220 : vector<8x128xf32>
    %c6_i32 = arith.constant 6 : i32
    %cst_78 = arith.constant dense<0.000000e+00> : vector<8x512xf32>
    %222 = tpu.matmul %221, %3, %cst_78 {dimension_numbers = #tpu.dot_dimension_numbers<[1], [0], [0], [1], [0, 0, 1, 1], [], []>} : vector<8x128xf32>, vector<128x512xf32>, vector<8x512xf32> -> vector<8x512xf32>
    %223 = arith.index_cast %c6_i32 : i32 to index
    %c0_79 = arith.constant 0 : index
    %c0_80 = arith.constant 0 : index
    %224 = vector.load %arg2[%223, %c0_79, %c0_80] : memref<8x8x512xf32, #tpu.memory_space<vmem>>, vector<1x8x512xf32>
    %225 = vector.shape_cast %224 : vector<1x8x512xf32> to vector<8x512xf32>
    %226 = arith.addf %225, %222 : vector<8x512xf32>
    %227 = vector.extract_strided_slice %226 {offsets = [0, 0], sizes = [8, 128], strides = [1, 1]} : vector<8x512xf32> to vector<8x128xf32>
    %cst_81 = arith.constant 5.000000e-01 : f32
    %228 = vector.broadcast %cst_81 : f32 to vector<8x128xf32>
    %229 = arith.mulf %228, %227 : vector<8x128xf32>
    %230 = math.tanh %229 : vector<8x128xf32>
    %cst_82 = arith.constant 5.000000e-01 : f32
    %231 = vector.broadcast %cst_82 : f32 to vector<8x128xf32>
    %232 = arith.mulf %231, %230 : vector<8x128xf32>
    %cst_83 = arith.constant 5.000000e-01 : f32
    %233 = vector.broadcast %cst_83 : f32 to vector<8x128xf32>
    %234 = arith.addf %232, %233 : vector<8x128xf32>
    %235 = vector.extract_strided_slice %226 {offsets = [0, 128], sizes = [8, 128], strides = [1, 1]} : vector<8x512xf32> to vector<8x128xf32>
    %cst_84 = arith.constant 5.000000e-01 : f32
    %236 = vector.broadcast %cst_84 : f32 to vector<8x128xf32>
    %237 = arith.mulf %236, %235 : vector<8x128xf32>
    %238 = math.tanh %237 : vector<8x128xf32>
    %cst_85 = arith.constant 5.000000e-01 : f32
    %239 = vector.broadcast %cst_85 : f32 to vector<8x128xf32>
    %240 = arith.mulf %239, %238 : vector<8x128xf32>
    %cst_86 = arith.constant 5.000000e-01 : f32
    %241 = vector.broadcast %cst_86 : f32 to vector<8x128xf32>
    %242 = arith.addf %240, %241 : vector<8x128xf32>
    %243 = vector.extract_strided_slice %226 {offsets = [0, 256], sizes = [8, 128], strides = [1, 1]} : vector<8x512xf32> to vector<8x128xf32>
    %244 = math.tanh %243 : vector<8x128xf32>
    %245 = vector.extract_strided_slice %226 {offsets = [0, 384], sizes = [8, 128], strides = [1, 1]} : vector<8x512xf32> to vector<8x128xf32>
    %cst_87 = arith.constant 5.000000e-01 : f32
    %246 = vector.broadcast %cst_87 : f32 to vector<8x128xf32>
    %247 = arith.mulf %246, %245 : vector<8x128xf32>
    %248 = math.tanh %247 : vector<8x128xf32>
    %cst_88 = arith.constant 5.000000e-01 : f32
    %249 = vector.broadcast %cst_88 : f32 to vector<8x128xf32>
    %250 = arith.mulf %249, %248 : vector<8x128xf32>
    %cst_89 = arith.constant 5.000000e-01 : f32
    %251 = vector.broadcast %cst_89 : f32 to vector<8x128xf32>
    %252 = arith.addf %250, %251 : vector<8x128xf32>
    %253 = arith.mulf %242, %219 : vector<8x128xf32>
    %254 = arith.mulf %234, %244 : vector<8x128xf32>
    %255 = arith.addf %253, %254 : vector<8x128xf32>
    %256 = math.tanh %255 : vector<8x128xf32>
    %257 = arith.mulf %252, %256 : vector<8x128xf32>
    %c7_i32 = arith.constant 7 : i32
    %cst_90 = arith.constant dense<0.000000e+00> : vector<8x512xf32>
    %258 = tpu.matmul %257, %3, %cst_90 {dimension_numbers = #tpu.dot_dimension_numbers<[1], [0], [0], [1], [0, 0, 1, 1], [], []>} : vector<8x128xf32>, vector<128x512xf32>, vector<8x512xf32> -> vector<8x512xf32>
    %259 = arith.index_cast %c7_i32 : i32 to index
    %c0_91 = arith.constant 0 : index
    %c0_92 = arith.constant 0 : index
    %260 = vector.load %arg2[%259, %c0_91, %c0_92] : memref<8x8x512xf32, #tpu.memory_space<vmem>>, vector<1x8x512xf32>
    %261 = vector.shape_cast %260 : vector<1x8x512xf32> to vector<8x512xf32>
    %262 = arith.addf %261, %258 : vector<8x512xf32>
    %263 = vector.extract_strided_slice %262 {offsets = [0, 0], sizes = [8, 128], strides = [1, 1]} : vector<8x512xf32> to vector<8x128xf32>
    %cst_93 = arith.constant 5.000000e-01 : f32
    %264 = vector.broadcast %cst_93 : f32 to vector<8x128xf32>
    %265 = arith.mulf %264, %263 : vector<8x128xf32>
    %266 = math.tanh %265 : vector<8x128xf32>
    %cst_94 = arith.constant 5.000000e-01 : f32
    %267 = vector.broadcast %cst_94 : f32 to vector<8x128xf32>
    %268 = arith.mulf %267, %266 : vector<8x128xf32>
    %cst_95 = arith.constant 5.000000e-01 : f32
    %269 = vector.broadcast %cst_95 : f32 to vector<8x128xf32>
    %270 = arith.addf %268, %269 : vector<8x128xf32>
    %271 = vector.extract_strided_slice %262 {offsets = [0, 128], sizes = [8, 128], strides = [1, 1]} : vector<8x512xf32> to vector<8x128xf32>
    %cst_96 = arith.constant 5.000000e-01 : f32
    %272 = vector.broadcast %cst_96 : f32 to vector<8x128xf32>
    %273 = arith.mulf %272, %271 : vector<8x128xf32>
    %274 = math.tanh %273 : vector<8x128xf32>
    %cst_97 = arith.constant 5.000000e-01 : f32
    %275 = vector.broadcast %cst_97 : f32 to vector<8x128xf32>
    %276 = arith.mulf %275, %274 : vector<8x128xf32>
    %cst_98 = arith.constant 5.000000e-01 : f32
    %277 = vector.broadcast %cst_98 : f32 to vector<8x128xf32>
    %278 = arith.addf %276, %277 : vector<8x128xf32>
    %279 = vector.extract_strided_slice %262 {offsets = [0, 256], sizes = [8, 128], strides = [1, 1]} : vector<8x512xf32> to vector<8x128xf32>
    %280 = math.tanh %279 : vector<8x128xf32>
    %281 = vector.extract_strided_slice %262 {offsets = [0, 384], sizes = [8, 128], strides = [1, 1]} : vector<8x512xf32> to vector<8x128xf32>
    %cst_99 = arith.constant 5.000000e-01 : f32
    %282 = vector.broadcast %cst_99 : f32 to vector<8x128xf32>
    %283 = arith.mulf %282, %281 : vector<8x128xf32>
    %284 = math.tanh %283 : vector<8x128xf32>
    %cst_100 = arith.constant 5.000000e-01 : f32
    %285 = vector.broadcast %cst_100 : f32 to vector<8x128xf32>
    %286 = arith.mulf %285, %284 : vector<8x128xf32>
    %cst_101 = arith.constant 5.000000e-01 : f32
    %287 = vector.broadcast %cst_101 : f32 to vector<8x128xf32>
    %288 = arith.addf %286, %287 : vector<8x128xf32>
    %289 = arith.mulf %278, %255 : vector<8x128xf32>
    %290 = arith.mulf %270, %280 : vector<8x128xf32>
    %291 = arith.addf %289, %290 : vector<8x128xf32>
    %292 = math.tanh %291 : vector<8x128xf32>
    %293 = arith.mulf %288, %292 : vector<8x128xf32>
    %c8_i32 = arith.constant 8 : i32
    %c0_102 = arith.constant 0 : index
    %c0_103 = arith.constant 0 : index
    %294 = vector.load %arg6[%c0_102, %c0_103] : memref<8x128xf32, #tpu.memory_space<vmem>>, vector<8x128xf32>
    tpu.vector_store %arg6[%c0_102, %c0_103], %293 {strides = array<i32>} : memref<8x128xf32, #tpu.memory_space<vmem>>, vector<8x128xf32>,
    %c0_104 = arith.constant 0 : index
    %c0_105 = arith.constant 0 : index
    %295 = vector.load %arg7[%c0_104, %c0_105] : memref<8x128xf32, #tpu.memory_space<vmem>>, vector<8x128xf32>
    tpu.vector_store %arg7[%c0_104, %c0_105], %291 {strides = array<i32>} : memref<8x128xf32, #tpu.memory_space<vmem>>, vector<8x128xf32>,
    %c1_i32_106 = arith.constant 1 : i32
    %296 = arith.cmpi eq, %arg1, %c1_i32_106 : i32
    %297 = arith.extui %296 : i1 to i32
    %c0_i32_107 = arith.constant 0 : i32
    %298 = arith.cmpi ne, %297, %c0_i32_107 : i32
    scf.if %298 {
      %c0_108 = arith.constant 0 : index
      %c0_109 = arith.constant 0 : index
      %299 = vector.load %arg4[%c0_108, %c0_109] : memref<8x128xf32, #tpu.memory_space<vmem>>, vector<8x128xf32>
      tpu.vector_store %arg4[%c0_108, %c0_109], %293 {strides = array<i32>} : memref<8x128xf32, #tpu.memory_space<vmem>>, vector<8x128xf32>,
      %c0_110 = arith.constant 0 : index
      %c0_111 = arith.constant 0 : index
      %300 = vector.load %arg5[%c0_110, %c0_111] : memref<8x128xf32, #tpu.memory_space<vmem>>, vector<8x128xf32>
      tpu.vector_store %arg5[%c0_110, %c0_111], %291 {strides = array<i32>} : memref<8x128xf32, #tpu.memory_space<vmem>>, vector<8x128xf32>,
    } else {
    }
    return
  }
  func.func @transform_0(%arg0: i32, %arg1: i32) -> (i32, i32, i32) {
    %c0_i32 = arith.constant 0 : i32
    %c0_i32_0 = arith.constant 0 : i32
    return %arg1, %arg0, %c0_i32 : i32, i32, i32
  }
  func.func @transform_1(%arg0: i32, %arg1: i32) -> (i32, i32) {
    %c0_i32 = arith.constant 0 : i32
    %c0_i32_0 = arith.constant 0 : i32
    %c0_i32_1 = arith.constant 0 : i32
    return %c0_i32, %c0_i32_0 : i32, i32
  }
  func.func @transform_2(%arg0: i32, %arg1: i32) -> (i32, i32) {
    %c0_i32 = arith.constant 0 : i32
    %c0_i32_0 = arith.constant 0 : i32
    return %arg0, %c0_i32 : i32, i32
  }
  func.func @transform_3(%arg0: i32, %arg1: i32) -> (i32, i32) {
    %c0_i32 = arith.constant 0 : i32
    %c0_i32_0 = arith.constant 0 : i32
    return %arg0, %c0_i32 : i32, i32
  }
}

</mosaic_0001>

<bundles_post_ra>
// kernel: encoder_forward.1
= control target key start
LH: loop header
LB: loop body
LE: loop exit
PB: predicated region body
PF: predicated region fallthrough
CT: control target
= control target key end

     0   :  { %s1996_s12 = smov 0   ;;  %s1998_s13 = smov 0   ;;  %s3263_s0 = inlined_call_operand.vmem [shape: f32[16,8,512], index: 0, kind: input, shape index: {}]   ;;  %s3264_s1 = inlined_call_operand.vmem [shape: f32[128,512], index: 1, kind: input, shape index: {}]   ;;  %s3265_s2 = inlined_call_operand.vmem [shape: f32[8,128], index: 2, kind: output, shape index: {0}]   ;;  %s3266_s3 = inlined_call_operand.vmem [shape: f32[8,128], index: 3, kind: output, shape index: {1}]  }
   0x1   :  { %s2000_s14 = smov 0  }
   0x2 LB: > { %s23_s15 = sadd.s32 1, %s1968_s13  ;;  %p1741_p0 = scmp.ge.s32.totalorder %s1972_s14, 1  ;;  %s1972_s14 = sphi %s2000_s14, %s14_s14   ;;  %s1968_s13 = sphi %s1998_s13, %s3463_s13   ;;  %s1964_s12 = sphi %s1996_s12, %s3462_s12  }
   0x3   : > { %p24_p1 = scmp.ge.s32.totalorder %s23_s15, 2  ;;  %p160_p2 = scmp.lt.s32.totalorder %s1972_s14, 3 }
   0x5   : > { %s3465_s15 = smov (%p24_p1, %s23_s15), 0  ;;  %p161_p3 = pnand %p1741_p0, %p160_p2 }
   0x7   : > { %164 = sbr.rel (%p161_p3) target bundleno = 1952 (0x7a0), region = 28 }
   0xc   : > { %s1742_s16 = sshll.u32 %s1964_s12, 3  ;;  %p1745_p5 = scmp.ne.s32.totalorder %s1964_s12, 0 }
   0xd   : > { %p193_p4 = scmp.lt.s32.totalorder %s1742_s16, 15 }
   0xe   : > { %214 = sbr.rel (%p1745_p5) target bundleno = 21 (0x15), region = 32 }
   0xf   : > { %s3467_s16 = smov (!%p193_p4, %s1742_s16), 15 }
  0x10   : > { %s1779_s17 = sshll.u32 %s3467_s16, 5 }
  0x11   : > { %s2020_s20 = scalar_lea.vmem %s3263_s0, %s1779_s17 }
  0x13   : > { %v1974_v0 = vmov 0.0  }
  0x14   : > { %215 = vst [vmem:[#allocation2] sm:$0xff] %v1974_v0  ;;  %216 = vst [vmem:[#allocation3] sm:$0xff] %v1974_v0 }
  0x15 PF: > { %v2026_v1 = vld [vmem:[%s3264_s1 + $0x1e8] sm:$0xff]  ;;  %v2031_v2 = vld [vmem:[%s3264_s1 + $0x1e0] sm:$0xff]  ;;  %v3267_v5 = vmov 0.0   ;;  %v2054_v7 = vld [vmem:[%s3264_s1 + $0x1f8] sm:$0xff]  ;;  %p1774_p6 = scmp.ne.s32.totalorder %s1964_s12, 1 }
  0x16   : > { %3334 = vst [vmem:[#allocation4_spill] sm:$0xff] %v2026_v1  ;;  %v2036_v3 = vld [vmem:[%s3264_s1 + $0x1c8] sm:$0xff]  ;;  %283 = vmatprep.subr.mxu0 %v2026_v1  ;;  %v2042_v4 = vld [vmem:[%s3264_s1 + $0x1c0] sm:$0xff]  ;;  %347 = vmatprep.mubr.f32.mxu0 %v3267_v5  ;;  %3335 = vst [vmem:[#allocation5_spill] sm:$0xff] %v2054_v7 }
  0x17   : > { %284 = vmatpush1.msra.mxu0 %v2031_v2  ;;  %v2049_v6 = vld [vmem:[%s3264_s1 + $0x1a8] sm:$0xff]  ;;  %418 = vmatprep.mubr.f32.mxu1 %v3267_v5  ;;  %v2061_v8 = vld [vmem:[%s3264_s1 + $0x1a0] sm:$0xff]  ;;  %v2067_v9 = vld [vmem:[%s3264_s1 + $0x1f0] sm:$0xff] }
  0x18   : > { %285 = vmatprep.subr.mxu0 %v2036_v3  ;;  %354 = vmatprep.subr.mxu1 %v2054_v7  ;;  %v2072_v10 = vld [vmem:[%s3264_s1 + $0x1d8] sm:$0xff]  ;;  %v2078_v11 = vld [vmem:[%s3264_s1 + $0x188] sm:$0xff]  ;;  %v2084_v12 = vld [vmem:[%s3264_s1 + $0x1d0] sm:$0xff] }
  0x19   : > { %286 = vmatpush1.msra.mxu0 %v2042_v4  ;;  %355 = vmatpush1.msra.mxu1 %v2067_v9  ;;  %v2090_v13 = vld [vmem:[%s3264_s1 + $0x180] sm:$0xff]  ;;  %v2096_v14 = vld [vmem:[%s3264_s1 + $0x1b8] sm:$0xff]  ;;  %v2101_v15 = vld [vmem:[%s3264_s1 + $0x1b0] sm:$0xff] }
  0x1a   : > { %287 = vmatprep.subr.mxu0 %v2049_v6  ;;  %356 = vmatprep.subr.mxu1 %v2072_v10  ;;  %v2107_v16 = vld [vmem:[%s3264_s1 + $0x168] sm:$0xff]  ;;  %v2113_v17 = vld [vmem:[%s3264_s1 + $0x198] sm:$0xff]  ;;  %v2119_v18 = vld [vmem:[%s3264_s1 + $0x160] sm:$0xff] }
  0x1b   : > { %288 = vmatpush1.msra.mxu0 %v2061_v8  ;;  %357 = vmatpush1.msra.mxu1 %v2084_v12  ;;  %v2125_v19 = vld [vmem:[%s3264_s1 + $0x190] sm:$0xff]  ;;  %v2131_v20 = vld [vmem:[%s3264_s1 + $0x148] sm:$0xff]  ;;  %v2137_v21 = vld [vmem:[%s3264_s1 + $0x178] sm:$0xff] }
  0x1c   : > { %289 = vmatprep.subr.mxu0 %v2078_v11  ;;  %358 = vmatprep.subr.mxu1 %v2096_v14  ;;  %v2143_v22 = vld [vmem:[%s3264_s1 + $0x140] sm:$0xff]  ;;  %v2149_v23 = vld [vmem:[%s3264_s1 + $0x170] sm:$0xff]  ;;  %v2155_v24 = vld [vmem:[%s3264_s1 + $0x128] sm:$0xff] }
  0x1d   : > { %290 = vmatpush1.msra.mxu0 %v2090_v13  ;;  %359 = vmatpush1.msra.mxu1 %v2101_v15  ;;  %v2161_v25 = vld [vmem:[%s3264_s1 + $0x158] sm:$0xff]  ;;  %v2167_v26 = vld [vmem:[%s3264_s1 + $0x120] sm:$0xff]  ;;  %v2173_v27 = vld [vmem:[%s3264_s1 + $0x150] sm:$0xff] }
  0x1e   : > { %291 = vmatprep.subr.mxu0 %v2107_v16  ;;  %360 = vmatprep.subr.mxu1 %v2113_v17  ;;  %v2179_v28 = vld [vmem:[%s3264_s1 + $0x108] sm:$0xff]  ;;  %v2185_v29 = vld [vmem:[%s3264_s1 + $0x138] sm:$0xff]  ;;  %v2191_v30 = vld [vmem:[%s3264_s1 + $0x100] sm:$0xff] }
  0x1f   : > { %292 = vmatpush1.msra.mxu0 %v2119_v18  ;;  %361 = vmatpush1.msra.mxu1 %v2125_v19  ;;  %v2197_v31 = vld [vmem:[%s3264_s1 + $0x130] sm:$0xff]  ;;  %v2203_v32 = vld [vmem:[%s3264_s1 + $0xe8] sm:$0xff]  ;;  %v2209_v33 = vld [vmem:[%s3264_s1 + $0x118] sm:$0xff] }
  0x20   : > { %293 = vmatprep.subr.mxu0 %v2131_v20  ;;  %362 = vmatprep.subr.mxu1 %v2137_v21  ;;  %v2215_v34 = vld [vmem:[%s3264_s1 + $0xe0] sm:$0xff]  ;;  %v2221_v35 = vld [vmem:[%s3264_s1 + $0x110] sm:$0xff]  ;;  %v2227_v36 = vld [vmem:[%s3264_s1 + $0xc8] sm:$0xff] }
  0x21   : > { %294 = vmatpush1.msra.mxu0 %v2143_v22  ;;  %363 = vmatpush1.msra.mxu1 %v2149_v23  ;;  %v2233_v37 = vld [vmem:[%s3264_s1 + $0xf8] sm:$0xff]  ;;  %v2239_v38 = vld [vmem:[%s3264_s1 + $0xc0] sm:$0xff]  ;;  %v2245_v39 = vld [vmem:[%s3264_s1 + $0xf0] sm:$0xff] }
  0x22   : > { %295 = vmatprep.subr.mxu0 %v2155_v24  ;;  %364 = vmatprep.subr.mxu1 %v2161_v25  ;;  %v2251_v40 = vld [vmem:[%s3264_s1 + $0xa8] sm:$0xff]  ;;  %v2257_v41 = vld [vmem:[%s3264_s1 + $0xd8] sm:$0xff]  ;;  %v2263_v42 = vld [vmem:[%s3264_s1 + $0xa0] sm:$0xff] }
  0x23   : > { %296 = vmatpush1.msra.mxu0 %v2167_v26  ;;  %365 = vmatpush1.msra.mxu1 %v2173_v27  ;;  %v2269_v43 = vld [vmem:[%s3264_s1 + $0xd0] sm:$0xff]  ;;  %v2275_v44 = vld [vmem:[%s3264_s1 + $0x88] sm:$0xff]  ;;  %v2281_v45 = vld [vmem:[%s3264_s1 + $0xb8] sm:$0xff] }
  0x24   : > { %297 = vmatprep.subr.mxu0 %v2179_v28  ;;  %366 = vmatprep.subr.mxu1 %v2185_v29  ;;  %v2287_v46 = vld [vmem:[%s3264_s1 + $0x80] sm:$0xff]  ;;  %v2293_v47 = vld [vmem:[%s3264_s1 + $0xb0] sm:$0xff]  ;;  %v2299_v48 = vld [vmem:[%s3264_s1 + $0x68] sm:$0xff] }
  0x25   : > { %298 = vmatpush1.msra.mxu0 %v2191_v30  ;;  %367 = vmatpush1.msra.mxu1 %v2197_v31  ;;  %3336 = vst [vmem:[#allocation6_spill] sm:$0xff] %v2287_v46  ;;  %3337 = vst [vmem:[#allocation7_spill] sm:$0xff] %v2299_v48  ;;  %v2305_v49 = vld [vmem:[%s3264_s1 + $0x98] sm:$0xff]  ;;  %v2311_v50 = vld [vmem:[%s3264_s1 + $0x60] sm:$0xff] }
  0x26   : > { %299 = vmatprep.subr.mxu0 %v2203_v32  ;;  %368 = vmatprep.subr.mxu1 %v2209_v33  ;;  %3338 = vst [vmem:[#allocation8_spill] sm:$0xff] %v2305_v49  ;;  %3339 = vst [vmem:[#allocation9_spill] sm:$0xff] %v2311_v50  ;;  %v2317_v51 = vld [vmem:[%s3264_s1 + $0x90] sm:$0xff]  ;;  %v2323_v52 = vld [vmem:[%s3264_s1 + $0x48] sm:$0xff] }
  0x27   : > { %300 = vmatpush1.msra.mxu0 %v2215_v34  ;;  %369 = vmatpush1.msra.mxu1 %v2221_v35  ;;  %3340 = vst [vmem:[#allocation10_spill] sm:$0xff] %v2317_v51  ;;  %3341 = vst [vmem:[#allocation11_spill] sm:$0xff] %v2323_v52  ;;  %v2329_v53 = vld [vmem:[%s3264_s1 + $0x78] sm:$0xff]  ;;  %v2335_v54 = vld [vmem:[%s3264_s1 + $0x40] sm:$0xff] }
  0x28   : > { %301 = vmatprep.subr.mxu0 %v2227_v36  ;;  %370 = vmatprep.subr.mxu1 %v2233_v37  ;;  %3342 = vst [vmem:[#allocation12_spill] sm:$0xff] %v2329_v53  ;;  %3343 = vst [vmem:[#allocation13_spill] sm:$0xff] %v2335_v54  ;;  %v2341_v55 = vld [vmem:[%s3264_s1 + $0x70] sm:$0xff]  ;;  %v2347_v56 = vld [vmem:[%s3264_s1 + $0x28] sm:$0xff] }
  0x29   : > { %302 = vmatpush1.msra.mxu0 %v2239_v38  ;;  %371 = vmatpush1.msra.mxu1 %v2245_v39  ;;  %3344 = vst [vmem:[#allocation14_spill] sm:$0xff] %v2341_v55  ;;  %3345 = vst [vmem:[#allocation15_spill] sm:$0xff] %v2347_v56  ;;  %v2353_v57 = vld [vmem:[%s3264_s1 + $0x58] sm:$0xff]  ;;  %v2359_v58 = vld [vmem:[%s3264_s1 + $0x20] sm:$0xff] }
  0x2a   : > { %303 = vmatprep.subr.mxu0 %v2251_v40  ;;  %372 = vmatprep.subr.mxu1 %v2257_v41  ;;  %3346 = vst [vmem:[#allocation16_spill] sm:$0xff] %v2353_v57  ;;  %3347 = vst [vmem:[#allocation17_spill] sm:$0xff] %v2359_v58  ;;  %v2365_v59 = vld [vmem:[%s3264_s1 + $0x50] sm:$0xff]  ;;  %v2371_v60 = vld [vmem:[%s3264_s1 + $0x8] sm:$0xff] }
  0x2b   : > { %304 = vmatpush1.msra.mxu0 %v2263_v42  ;;  %373 = vmatpush1.msra.mxu1 %v2269_v43  ;;  %3348 = vst [vmem:[#allocation18_spill] sm:$0xff] %v2365_v59  ;;  %3349 = vst [vmem:[#allocation19_spill] sm:$0xff] %v2371_v60  ;;  %v2377_v61 = vld [vmem:[%s3264_s1 + $0x38] sm:$0xff]  ;;  %v2383_v62 = vld [vmem:[%s3264_s1] sm:$0xff] }
  0x2c   : > { %305 = vmatprep.subr.mxu0 %v2275_v44  ;;  %374 = vmatprep.subr.mxu1 %v2281_v45  ;;  %3350 = vst [vmem:[#allocation20_spill] sm:$0xff] %v2377_v61  ;;  %3351 = vst [vmem:[#allocation21_spill] sm:$0xff] %v2383_v62  ;;  %v2389_v63 = vld [vmem:[%s3264_s1 + $0x30] sm:$0xff]  ;;  %v281_v0 = vld [vmem:[#allocation2] sm:$0xff] }
  0x2d   : > { %306 = vmatpush1.msra.mxu0 %v2287_v46  ;;  %375 = vmatpush1.msra.mxu1 %v2293_v47  ;;  %3352 = vst [vmem:[#allocation22_spill] sm:$0xff] %v2389_v63  ;;  %v2396_v5 = vld [vmem:[%s3264_s1 + $0x18] sm:$0xff] }
  0x2e   : > { %307 = vmatprep.subr.mxu0 %v2299_v48  ;;  %376 = vmatprep.subr.mxu1 %v2305_v49  ;;  %3353 = vst [vmem:[#allocation23_spill] sm:$0xff] %v2396_v5 }
  0x2f   : > { %308 = vmatpush1.msra.mxu0 %v2311_v50  ;;  %377 = vmatpush1.msra.mxu1 %v2317_v51 }
  0x30   : > { %309 = vmatprep.subr.mxu0 %v2323_v52  ;;  %378 = vmatprep.subr.mxu1 %v2329_v53 }
  0x31   : > { %310 = vmatpush1.msra.mxu0 %v2335_v54  ;;  %379 = vmatpush1.msra.mxu1 %v2341_v55 }
  0x32   : > { %311 = vmatprep.subr.mxu0 %v2347_v56  ;;  %380 = vmatprep.subr.mxu1 %v2353_v57  ;;  %v2403_v56 = vld [vmem:[%s3264_s1 + $0x10] sm:$0xff] }
  0x33   : > { %312 = vmatpush1.msra.mxu0 %v2359_v58  ;;  %381 = vmatpush1.msra.mxu1 %v2365_v59  ;;  %3354 = vst [vmem:[#allocation24_spill] sm:$0xff] %v2403_v56 }
  0x34   : > { %313 = vmatprep.subr.mxu0 %v2371_v60  ;;  %382 = vmatprep.subr.mxu1 %v2377_v61 }
  0x35   : > { %314 = vmatpush1.msra.mxu0 %v2383_v62  ;;  %383 = vmatpush1.msra.mxu1 %v2389_v63 }
  0x36   : > { %348 = vmatmul.mubr.f32.vlgmr.msra.gmra.mxu0 %v281_v0  ;;  %384 = vmatprep.subr.mxu1 %v2396_v5 }
  0x37   : > { %385 = vmatpush1.msra.mxu1 %v2403_v56  ;;  %451 = vmatprep.subr.mxu0 %v2026_v1 }
  0x38   : > { %419 = vmatmul.mubr.f32.vlgmr.msra.gmra.mxu1 %v281_v0  ;;  %522 = vmatprep.subr.mxu1 %v2054_v7  ;;  %v3355_v0 = vld [vmem:[#allocation15_spill] sm:$0xff] }
  0x39   : > { %452 = vmatpush1.msra.mxu0 %v2031_v2  ;;  %523 = vmatpush1.msra.mxu1 %v2067_v9 }
  0x3a   : > { %453 = vmatprep.subr.mxu0 %v2036_v3  ;;  %524 = vmatprep.subr.mxu1 %v2072_v10 }
  0x3b   : > { %454 = vmatpush1.msra.mxu0 %v2042_v4  ;;  %525 = vmatpush1.msra.mxu1 %v2084_v12 }
  0x3c   : > { %455 = vmatprep.subr.mxu0 %v2049_v6  ;;  %526 = vmatprep.subr.mxu1 %v2096_v14 }
  0x3d   : > { %456 = vmatpush1.msra.mxu0 %v2061_v8  ;;  %527 = vmatpush1.msra.mxu1 %v2101_v15 }
  0x3e   : > { %457 = vmatprep.subr.mxu0 %v2078_v11  ;;  %528 = vmatprep.subr.mxu1 %v2113_v17 }
  0x3f   : > { %458 = vmatpush1.msra.mxu0 %v2090_v13  ;;  %529 = vmatpush1.msra.mxu1 %v2125_v19 }
  0x40   : > { %459 = vmatprep.subr.mxu0 %v2107_v16  ;;  %530 = vmatprep.subr.mxu1 %v2137_v21 }
  0x41   : > { %460 = vmatpush1.msra.mxu0 %v2119_v18  ;;  %531 = vmatpush1.msra.mxu1 %v2149_v23 }
  0x42   : > { %461 = vmatprep.subr.mxu0 %v2131_v20  ;;  %532 = vmatprep.subr.mxu1 %v2161_v25 }
  0x43   : > { %462 = vmatpush1.msra.mxu0 %v2143_v22  ;;  %533 = vmatpush1.msra.mxu1 %v2173_v27 }
  0x44   : > { %463 = vmatprep.subr.mxu0 %v2155_v24  ;;  %534 = vmatprep.subr.mxu1 %v2185_v29 }
  0x45   : > { %464 = vmatpush1.msra.mxu0 %v2167_v26  ;;  %535 = vmatpush1.msra.mxu1 %v2197_v31 }
  0x46   : > { %465 = vmatprep.subr.mxu0 %v2179_v28  ;;  %536 = vmatprep.subr.mxu1 %v2209_v33 }
  0x47   : > { %466 = vmatpush1.msra.mxu0 %v2191_v30  ;;  %537 = vmatpush1.msra.mxu1 %v2221_v35 }
  0x48   : > { %467 = vmatprep.subr.mxu0 %v2203_v32  ;;  %538 = vmatprep.subr.mxu1 %v2233_v37 }
  0x49   : > { %468 = vmatpush1.msra.mxu0 %v2215_v34  ;;  %539 = vmatpush1.msra.mxu1 %v2245_v39 }
  0x4a   : > { %469 = vmatprep.subr.mxu0 %v2227_v36  ;;  %540 = vmatprep.subr.mxu1 %v2257_v41 }
  0x4b   : > { %470 = vmatpush1.msra.mxu0 %v2239_v38  ;;  %541 = vmatpush1.msra.mxu1 %v2269_v43 }
  0x4c   : > { %471 = vmatprep.subr.mxu0 %v2251_v40  ;;  %542 = vmatprep.subr.mxu1 %v2281_v45 }
  0x4d   : > { %472 = vmatpush1.msra.mxu0 %v2263_v42  ;;  %543 = vmatpush1.msra.mxu1 %v2293_v47 }
  0x4e   : > { %473 = vmatprep.subr.mxu0 %v2275_v44  ;;  %544 = vmatprep.subr.mxu1 %v2305_v49 }
  0x4f   : > { %474 = vmatpush1.msra.mxu0 %v2287_v46  ;;  %545 = vmatpush1.msra.mxu1 %v2317_v51 }
  0x50   : > { %475 = vmatprep.subr.mxu0 %v2299_v48  ;;  %546 = vmatprep.subr.mxu1 %v2329_v53 }
  0x51   : > { %476 = vmatpush1.msra.mxu0 %v2311_v50  ;;  %547 = vmatpush1.msra.mxu1 %v2341_v55 }
  0x52   : > { %477 = vmatprep.subr.mxu0 %v2323_v52  ;;  %548 = vmatprep.subr.mxu1 %v2353_v57  ;;  %v3356_v57 = vmov 0.0  }
  0x53   : > { %478 = vmatpush1.msra.mxu0 %v2335_v54  ;;  %549 = vmatpush1.msra.mxu1 %v2365_v59 }
  0x54   : > { %479 = vmatprep.subr.mxu0 %v3355_v0  ;;  %550 = vmatprep.subr.mxu1 %v2377_v61 }
  0x55   : > { %480 = vmatpush1.msra.mxu0 %v2359_v58  ;;  %551 = vmatpush1.msra.mxu1 %v2389_v63  ;;  %v425_v58 = vld [vmem:[%s2020_s20] sm:$0xff]  ;;  %v426_v63 = vld [vmem:[%s2020_s20 + $0x8] sm:$0xff] }
  0x56   : > { %481 = vmatprep.subr.mxu0 %v2371_v60  ;;  %552 = vmatprep.subr.mxu1 %v2396_v5  ;;  %v427_v5 = vld [vmem:[%s2020_s20 + $0x10] sm:$0xff] }
  0x57   : > { %482 = vmatpush1.msra.mxu0 %v2383_v62  ;;  %515 = vmatprep.mubr.f32.mxu0 %v3356_v57 }
  0x58   : > { %553 = vmatpush1.msra.mxu1 %v2403_v56  ;;  %586 = vmatprep.mubr.f32.mxu1 %v3356_v57  ;;  %v428_v57 = vld [vmem:[%s2020_s20 + $0x18] sm:$0xff] }
  0x59   : > { %620 = vmatprep.subr.mxu0 %v2026_v1  ;;  %691 = vmatprep.subr.mxu1 %v2054_v7 }
  0xf6   : > { %v349_v61 = vpop.f32.mrf.mxu0 }
  0xf7   : > { %v429_v0 = vadd.f32 %v425_v58, %v349_v61  ;;  %v282_v61 = vld [vmem:[#allocation3] sm:$0xff] }
  0xf8   : > { %v351_v60 = vpop.f32.mrf.mxu0  ;;  %v420_v59 = vpop.f32.mrf.mxu1 }
  0xf9   : > { %v433_v54 = vmul.f32 0.5, %v429_v0  ;;  %v430_v62 = vadd.f32 %v426_v63, %v351_v60  ;;  %v431_v55 = vadd.f32 %v427_v5, %v420_v59  ;;  %v3365_v59 = vld [vmem:[#allocation16_spill] sm:$0xff]  ;;  %v3367_v63 = vld [vmem:[#allocation18_spill] sm:$0xff] }
  0xfa   : > { %v422_v56 = vpop.f32.mrf.mxu1 }
  0xfb   : > { %1806 = vtanh.f32 %v433_v54  ;;  %v437_v52 = vmul.f32 0.5, %v430_v62  ;;  %v432_v1 = vadd.f32 %v428_v57, %v422_v56  ;;  %v3364_v57 = vld [vmem:[#allocation11_spill] sm:$0xff]  ;;  %v3366_v62 = vld [vmem:[#allocation13_spill] sm:$0xff] }
  0xfd   : > { %1808 = vtanh.f32 %v437_v52  ;;  %v442_v50 = vmul.f32 0.5, %v432_v1 }
  0xfe   : > { %1810 = vtanh.f32 %v431_v55 }
  0xff   : > { %1812 = vtanh.f32 %v442_v50  ;;  %v3361_v50 = vld [vmem:[#allocation12_spill] sm:$0xff] }
 0x108   : > { %v1807_v7 = vpop.eup %1806 }
 0x109   : > { %v435_v53 = vmul.f32 0.5, %v1807_v7  ;;  %v3357_v7 = vld [vmem:[#allocation8_spill] sm:$0xff] }
 0x10a   : > { %v1809_v48 = vpop.eup %1808 }
 0x10b   : > { %v436_v51 = vadd.f32 0.5, %v435_v53  ;;  %v439_v46 = vmul.f32 0.5, %v1809_v48  ;;  %v1811_v58 = vpop.eup %1810  ;;  %v3359_v48 = vld [vmem:[#allocation10_spill] sm:$0xff] }
 0x10c   : > { %v1813_v5 = vpop.eup %1812  ;;  %v3363_v53 = vld [vmem:[#allocation14_spill] sm:$0xff] }
 0x10d   : > { %v440_v49 = vadd.f32 0.5, %v439_v46  ;;  %v447_v60 = vmul.f32 %v1811_v58, %v436_v51  ;;  %v444_v52 = vmul.f32 0.5, %v1813_v5  ;;  %v3358_v46 = vld [vmem:[#allocation6_spill] sm:$0xff]  ;;  %v3362_v51 = vld [vmem:[#allocation9_spill] sm:$0xff]  ;;  %v3368_v58 = vld [vmem:[#allocation15_spill] sm:$0xff] }
 0x10e   : > { %v3372_v5 = vld [vmem:[#allocation19_spill] sm:$0xff] }
 0x10f   : > { %v446_v0 = vmul.f32 %v440_v49, %v282_v61  ;;  %v445_v55 = vadd.f32 0.5, %v444_v52  ;;  %v3360_v49 = vld [vmem:[#allocation7_spill] sm:$0xff]  ;;  %v3369_v61 = vld [vmem:[#allocation20_spill] sm:$0xff] }
 0x110   : > { %v3373_v52 = vld [vmem:[#allocation23_spill] sm:$0xff] }
 0x111   : > { %v2481_v54 = vadd.f32 %v447_v60, %v446_v0  ;;  %v3370_v0 = vld [vmem:[#allocation17_spill] sm:$0xff]  ;;  %v3371_v60 = vld [vmem:[#allocation22_spill] sm:$0xff] }
 0x113   : > { %1814 = vtanh.f32 %v2481_v54 }
 0x120   : > { %v1815_v56 = vpop.eup %1814 }
 0x121   : > { %v450_v1 = vmul.f32 %v1815_v56, %v445_v55  ;;  %v3374_v55 = vld [vmem:[#allocation21_spill] sm:$0xff]  ;;  %v3375_v56 = vmov 0.0  }
 0x123   : > { %516 = vmatmul.mubr.f32.vlgmr.msra.gmra.mxu0 %v450_v1  ;;  %587 = vmatmul.mubr.f32.vlgmr.msra.gmra.mxu1 %v450_v1  ;;  %v3376_v1 = vld [vmem:[#allocation24_spill] sm:$0xff] }
 0x124   : > { %621 = vmatpush1.msra.mxu0 %v2031_v2  ;;  %692 = vmatpush1.msra.mxu1 %v2067_v9 }
 0x125   : > { %622 = vmatprep.subr.mxu0 %v2036_v3  ;;  %693 = vmatprep.subr.mxu1 %v2072_v10 }
 0x126   : > { %623 = vmatpush1.msra.mxu0 %v2042_v4  ;;  %694 = vmatpush1.msra.mxu1 %v2084_v12 }
 0x127   : > { %624 = vmatprep.subr.mxu0 %v2049_v6  ;;  %695 = vmatprep.subr.mxu1 %v2096_v14 }
 0x128   : > { %625 = vmatpush1.msra.mxu0 %v2061_v8  ;;  %696 = vmatpush1.msra.mxu1 %v2101_v15 }
 0x129   : > { %626 = vmatprep.subr.mxu0 %v2078_v11  ;;  %697 = vmatprep.subr.mxu1 %v2113_v17 }
 0x12a   : > { %627 = vmatpush1.msra.mxu0 %v2090_v13  ;;  %698 = vmatpush1.msra.mxu1 %v2125_v19 }
 0x12b   : > { %628 = vmatprep.subr.mxu0 %v2107_v16  ;;  %699 = vmatprep.subr.mxu1 %v2137_v21 }
 0x12c   : > { %629 = vmatpush1.msra.mxu0 %v2119_v18  ;;  %700 = vmatpush1.msra.mxu1 %v2149_v23 }
 0x12d   : > { %630 = vmatprep.subr.mxu0 %v2131_v20  ;;  %701 = vmatprep.subr.mxu1 %v2161_v25 }
 0x12e   : > { %631 = vmatpush1.msra.mxu0 %v2143_v22  ;;  %702 = vmatpush1.msra.mxu1 %v2173_v27 }
 0x12f   : > { %632 = vmatprep.subr.mxu0 %v2155_v24  ;;  %703 = vmatprep.subr.mxu1 %v2185_v29 }
 0x130   : > { %633 = vmatpush1.msra.mxu0 %v2167_v26  ;;  %704 = vmatpush1.msra.mxu1 %v2197_v31 }
 0x131   : > { %634 = vmatprep.subr.mxu0 %v2179_v28  ;;  %705 = vmatprep.subr.mxu1 %v2209_v33 }
 0x132   : > { %635 = vmatpush1.msra.mxu0 %v2191_v30  ;;  %706 = vmatpush1.msra.mxu1 %v2221_v35 }
 0x133   : > { %636 = vmatprep.subr.mxu0 %v2203_v32  ;;  %707 = vmatprep.subr.mxu1 %v2233_v37 }
 0x134   : > { %637 = vmatpush1.msra.mxu0 %v2215_v34  ;;  %708 = vmatpush1.msra.mxu1 %v2245_v39 }
 0x135   : > { %638 = vmatprep.subr.mxu0 %v2227_v36  ;;  %709 = vmatprep.subr.mxu1 %v2257_v41 }
 0x136   : > { %639 = vmatpush1.msra.mxu0 %v2239_v38  ;;  %710 = vmatpush1.msra.mxu1 %v2269_v43 }
 0x137   : > { %640 = vmatprep.subr.mxu0 %v2251_v40  ;;  %711 = vmatprep.subr.mxu1 %v2281_v45 }
 0x138   : > { %641 = vmatpush1.msra.mxu0 %v2263_v42  ;;  %712 = vmatpush1.msra.mxu1 %v2293_v47 }
 0x139   : > { %642 = vmatprep.subr.mxu0 %v2275_v44  ;;  %713 = vmatprep.subr.mxu1 %v3357_v7 }
 0x13a   : > { %643 = vmatpush1.msra.mxu0 %v3358_v46  ;;  %714 = vmatpush1.msra.mxu1 %v3359_v48 }
 0x13b   : > { %644 = vmatprep.subr.mxu0 %v3360_v49  ;;  %715 = vmatprep.subr.mxu1 %v3361_v50 }
 0x13c   : > { %645 = vmatpush1.msra.mxu0 %v3362_v51  ;;  %716 = vmatpush1.msra.mxu1 %v3363_v53 }
 0x13d   : > { %646 = vmatprep.subr.mxu0 %v3364_v57  ;;  %717 = vmatprep.subr.mxu1 %v3365_v59 }
 0x13e   : > { %647 = vmatpush1.msra.mxu0 %v3366_v62  ;;  %718 = vmatpush1.msra.mxu1 %v3367_v63  ;;  %v1747_v63 = vld [vmem:[%s2020_s20 + $0x28] sm:$0xff] }
 0x13f   : > { %648 = vmatprep.subr.mxu0 %v3368_v58  ;;  %719 = vmatprep.subr.mxu1 %v3369_v61  ;;  %v3377_v58 = vld [vmem:[#allocation4_spill] sm:$0xff]  ;;  %v3378_v61 = vld [vmem:[#allocation5_spill] sm:$0xff] }
 0x140   : > { %649 = vmatpush1.msra.mxu0 %v3370_v0  ;;  %720 = vmatpush1.msra.mxu1 %v3371_v60  ;;  %v1746_v0 = vld [vmem:[%s2020_s20 + $0x20] sm:$0xff] }
 0x141   : > { %650 = vmatprep.subr.mxu0 %v3372_v5  ;;  %721 = vmatprep.subr.mxu1 %v3373_v52 }
 0x142   : > { %651 = vmatpush1.msra.mxu0 %v3374_v55  ;;  %684 = vmatprep.mubr.f32.mxu0 %v3375_v56  ;;  %v1748_v55 = vld [vmem:[%s2020_s20 + $0x30] sm:$0xff] }
 0x143   : > { %722 = vmatpush1.msra.mxu1 %v3376_v1  ;;  %755 = vmatprep.mubr.f32.mxu1 %v3375_v56  ;;  %v1749_v56 = vld [vmem:[%s2020_s20 + $0x38] sm:$0xff] }
 0x144   : > { %789 = vmatprep.subr.mxu0 %v3377_v58  ;;  %860 = vmatprep.subr.mxu1 %v3378_v61 }
 0x1e3   : > { %v517_v60 = vpop.f32.mrf.mxu0  ;;  %v588_v57 = vpop.f32.mrf.mxu1 }
 0x1e4   : > { %v598_v5 = vadd.f32 %v1746_v0, %v517_v60  ;;  %v600_v51 = vadd.f32 %v1748_v55, %v588_v57  ;;  %v3387_v55 = vld [vmem:[#allocation16_spill] sm:$0xff] }
 0x1e5   : > { %v519_v62 = vpop.f32.mrf.mxu0  ;;  %v590_v1 = vpop.f32.mrf.mxu1 }
 0x1e6   : > { %v602_v59 = vmul.f32 0.5, %v598_v5  ;;  %v599_v52 = vadd.f32 %v1747_v63, %v519_v62  ;;  %v601_v58 = vadd.f32 %v1749_v56, %v590_v1  ;;  %v3388_v56 = vld [vmem:[#allocation13_spill] sm:$0xff]  ;;  %v3389_v1 = vld [vmem:[#allocation18_spill] sm:$0xff] }
 0x1e8   : > { %1816 = vtanh.f32 %v602_v59  ;;  %v606_v53 = vmul.f32 0.5, %v599_v52  ;;  %v611_v50 = vmul.f32 0.5, %v601_v58  ;;  %v3386_v52 = vld [vmem:[#allocation11_spill] sm:$0xff] }
 0x1ea   : > { %1818 = vtanh.f32 %v606_v53 }
 0x1eb   : > { %1820 = vtanh.f32 %v600_v51 }
 0x1ec   : > { %1822 = vtanh.f32 %v611_v50  ;;  %v3384_v50 = vld [vmem:[#allocation9_spill] sm:$0xff] }
 0x1f5   : > { %v1817_v49 = vpop.eup %1816 }
 0x1f6   : > { %v604_v61 = vmul.f32 0.5, %v1817_v49  ;;  %v3383_v49 = vld [vmem:[#allocation12_spill] sm:$0xff] }
 0x1f7   : > { %v1819_v48 = vpop.eup %1818 }
 0x1f8   : > { %v605_v46 = vadd.f32 0.5, %v604_v61  ;;  %v608_v7 = vmul.f32 0.5, %v1819_v48  ;;  %v1821_v60 = vpop.eup %1820  ;;  %v3382_v48 = vld [vmem:[#allocation7_spill] sm:$0xff]  ;;  %v3385_v61 = vld [vmem:[#allocation14_spill] sm:$0xff] }
 0x1f9   : > { %v1823_v53 = vpop.eup %1822 }
 0x1fa   : > { %v609_v0 = vadd.f32 0.5, %v608_v7  ;;  %v616_v63 = vmul.f32 %v1821_v60, %v605_v46  ;;  %v613_v57 = vmul.f32 0.5, %v1823_v53  ;;  %v3380_v7 = vld [vmem:[#allocation6_spill] sm:$0xff]  ;;  %v3391_v60 = vld [vmem:[#allocation20_spill] sm:$0xff]  ;;  %v3394_v53 = vld [vmem:[#allocation19_spill] sm:$0xff] }
 0x1fb   : > { %v3381_v46 = vld [vmem:[#allocation10_spill] sm:$0xff] }
 0x1fc   : > { %v615_v62 = vmul.f32 %v609_v0, %v2481_v54  ;;  %v614_v51 = vadd.f32 0.5, %v613_v57  ;;  %v3379_v54 = vld [vmem:[#allocation8_spill] sm:$0xff]  ;;  %v3390_v0 = vld [vmem:[#allocation15_spill] sm:$0xff] }
 0x1fd   : > { %v3395_v57 = vld [vmem:[#allocation23_spill] sm:$0xff] }
 0x1fe   : > { %v2555_v59 = vadd.f32 %v616_v63, %v615_v62  ;;  %v3392_v62 = vld [vmem:[#allocation17_spill] sm:$0xff]  ;;  %v3393_v63 = vld [vmem:[#allocation22_spill] sm:$0xff] }
 0x200   : > { %1824 = vtanh.f32 %v2555_v59 }
 0x20d   : > { %v1825_v5 = vpop.eup %1824 }
 0x20e   : > { %v619_v58 = vmul.f32 %v1825_v5, %v614_v51  ;;  %v3396_v51 = vld [vmem:[#allocation21_spill] sm:$0xff]  ;;  %v3397_v5 = vmov 0.0  }
 0x210   : > { %685 = vmatmul.mubr.f32.vlgmr.msra.gmra.mxu0 %v619_v58  ;;  %756 = vmatmul.mubr.f32.vlgmr.msra.gmra.mxu1 %v619_v58  ;;  %v3398_v58 = vld [vmem:[#allocation24_spill] sm:$0xff] }
 0x211   : > { %790 = vmatpush1.msra.mxu0 %v2031_v2  ;;  %861 = vmatpush1.msra.mxu1 %v2067_v9 }
 0x212   : > { %791 = vmatprep.subr.mxu0 %v2036_v3  ;;  %862 = vmatprep.subr.mxu1 %v2072_v10 }
 0x213   : > { %792 = vmatpush1.msra.mxu0 %v2042_v4  ;;  %863 = vmatpush1.msra.mxu1 %v2084_v12 }
 0x214   : > { %793 = vmatprep.subr.mxu0 %v2049_v6  ;;  %864 = vmatprep.subr.mxu1 %v2096_v14 }
 0x215   : > { %794 = vmatpush1.msra.mxu0 %v2061_v8  ;;  %865 = vmatpush1.msra.mxu1 %v2101_v15 }
 0x216   : > { %795 = vmatprep.subr.mxu0 %v2078_v11  ;;  %866 = vmatprep.subr.mxu1 %v2113_v17 }
 0x217   : > { %796 = vmatpush1.msra.mxu0 %v2090_v13  ;;  %867 = vmatpush1.msra.mxu1 %v2125_v19 }
 0x218   : > { %797 = vmatprep.subr.mxu0 %v2107_v16  ;;  %868 = vmatprep.subr.mxu1 %v2137_v21 }
 0x219   : > { %798 = vmatpush1.msra.mxu0 %v2119_v18  ;;  %869 = vmatpush1.msra.mxu1 %v2149_v23 }
 0x21a   : > { %799 = vmatprep.subr.mxu0 %v2131_v20  ;;  %870 = vmatprep.subr.mxu1 %v2161_v25 }
 0x21b   : > { %800 = vmatpush1.msra.mxu0 %v2143_v22  ;;  %871 = vmatpush1.msra.mxu1 %v2173_v27 }
 0x21c   : > { %801 = vmatprep.subr.mxu0 %v2155_v24  ;;  %872 = vmatprep.subr.mxu1 %v2185_v29 }
 0x21d   : > { %802 = vmatpush1.msra.mxu0 %v2167_v26  ;;  %873 = vmatpush1.msra.mxu1 %v2197_v31 }
 0x21e   : > { %803 = vmatprep.subr.mxu0 %v2179_v28  ;;  %874 = vmatprep.subr.mxu1 %v2209_v33 }
 0x21f   : > { %804 = vmatpush1.msra.mxu0 %v2191_v30  ;;  %875 = vmatpush1.msra.mxu1 %v2221_v35 }
 0x220   : > { %805 = vmatprep.subr.mxu0 %v2203_v32  ;;  %876 = vmatprep.subr.mxu1 %v2233_v37 }
 0x221   : > { %806 = vmatpush1.msra.mxu0 %v2215_v34  ;;  %877 = vmatpush1.msra.mxu1 %v2245_v39 }
 0x222   : > { %807 = vmatprep.subr.mxu0 %v2227_v36  ;;  %878 = vmatprep.subr.mxu1 %v2257_v41 }
 0x223   : > { %808 = vmatpush1.msra.mxu0 %v2239_v38  ;;  %879 = vmatpush1.msra.mxu1 %v2269_v43 }
 0x224   : > { %809 = vmatprep.subr.mxu0 %v2251_v40  ;;  %880 = vmatprep.subr.mxu1 %v2281_v45 }
 0x225   : > { %810 = vmatpush1.msra.mxu0 %v2263_v42  ;;  %881 = vmatpush1.msra.mxu1 %v2293_v47 }
 0x226   : > { %811 = vmatprep.subr.mxu0 %v2275_v44  ;;  %882 = vmatprep.subr.mxu1 %v3379_v54 }
 0x227   : > { %812 = vmatpush1.msra.mxu0 %v3380_v7  ;;  %883 = vmatpush1.msra.mxu1 %v3381_v46 }
 0x228   : > { %813 = vmatprep.subr.mxu0 %v3382_v48  ;;  %884 = vmatprep.subr.mxu1 %v3383_v49 }
 0x229   : > { %814 = vmatpush1.msra.mxu0 %v3384_v50  ;;  %885 = vmatpush1.msra.mxu1 %v3385_v61 }
 0x22a   : > { %815 = vmatprep.subr.mxu0 %v3386_v52  ;;  %886 = vmatprep.subr.mxu1 %v3387_v55 }
 0x22b   : > { %816 = vmatpush1.msra.mxu0 %v3388_v56  ;;  %887 = vmatpush1.msra.mxu1 %v3389_v1  ;;  %v1751_v1 = vld [vmem:[%s2020_s20 + $0x48] sm:$0xff] }
 0x22c   : > { %817 = vmatprep.subr.mxu0 %v3390_v0  ;;  %888 = vmatprep.subr.mxu1 %v3391_v60  ;;  %v3399_v0 = vld [vmem:[#allocation4_spill] sm:$0xff]  ;;  %v3400_v60 = vld [vmem:[#allocation5_spill] sm:$0xff] }
 0x22d   : > { %818 = vmatpush1.msra.mxu0 %v3392_v62  ;;  %889 = vmatpush1.msra.mxu1 %v3393_v63  ;;  %v1750_v62 = vld [vmem:[%s2020_s20 + $0x40] sm:$0xff] }
 0x22e   : > { %819 = vmatprep.subr.mxu0 %v3394_v53  ;;  %890 = vmatprep.subr.mxu1 %v3395_v57 }
 0x22f   : > { %820 = vmatpush1.msra.mxu0 %v3396_v51  ;;  %853 = vmatprep.mubr.f32.mxu0 %v3397_v5  ;;  %v1752_v51 = vld [vmem:[%s2020_s20 + $0x50] sm:$0xff] }
 0x230   : > { %891 = vmatpush1.msra.mxu1 %v3398_v58  ;;  %924 = vmatprep.mubr.f32.mxu1 %v3397_v5  ;;  %v1753_v5 = vld [vmem:[%s2020_s20 + $0x58] sm:$0xff] }
 0x231   : > { %958 = vmatprep.subr.mxu0 %v3399_v0  ;;  %1029 = vmatprep.subr.mxu1 %v3400_v60 }
 0x2d0   : > { %v686_v63 = vpop.f32.mrf.mxu0  ;;  %v757_v52 = vpop.f32.mrf.mxu1 }
 0x2d1   : > { %v767_v53 = vadd.f32 %v1750_v62, %v686_v63  ;;  %v769_v50 = vadd.f32 %v1752_v51, %v757_v52 }
 0x2d2   : > { %v688_v56 = vpop.f32.mrf.mxu0  ;;  %v759_v58 = vpop.f32.mrf.mxu1 }
 0x2d3   : > { %v771_v55 = vmul.f32 0.5, %v767_v53  ;;  %v768_v57 = vadd.f32 %v1751_v1, %v688_v56  ;;  %v770_v0 = vadd.f32 %v1753_v5, %v759_v58 }
 0x2d5   : > { %1826 = vtanh.f32 %v771_v55  ;;  %v775_v61 = vmul.f32 0.5, %v768_v57  ;;  %v780_v49 = vmul.f32 0.5, %v770_v0 }
 0x2d7   : > { %1828 = vtanh.f32 %v775_v61 }
 0x2d8   : > { %1830 = vtanh.f32 %v769_v50 }
 0x2d9   : > { %1832 = vtanh.f32 %v780_v49 }
 0x2e2   : > { %v1827_v48 = vpop.eup %1826 }
 0x2e3   : > { %v773_v60 = vmul.f32 0.5, %v1827_v48 }
 0x2e4   : > { %v1829_v46 = vpop.eup %1828 }
 0x2e5   : > { %v774_v7 = vadd.f32 0.5, %v773_v60  ;;  %v777_v54 = vmul.f32 0.5, %v1829_v46  ;;  %v1831_v63 = vpop.eup %1830 }
 0x2e6   : > { %v1833_v61 = vpop.eup %1832 }
 0x2e7   : > { %v778_v62 = vadd.f32 0.5, %v777_v54  ;;  %v785_v1 = vmul.f32 %v1831_v63, %v774_v7  ;;  %v782_v52 = vmul.f32 0.5, %v1833_v61 }
 0x2e9   : > { %v784_v56 = vmul.f32 %v778_v62, %v2555_v59  ;;  %v783_v50 = vadd.f32 0.5, %v782_v52  ;;  %v2709_v52 = vld [vmem:[%s3264_s1 + $0x1e0] sm:$0xff] }
 0x2eb   : > { %v2629_v55 = vadd.f32 %v785_v1, %v784_v56 }
 0x2ed   : > { %1834 = vtanh.f32 %v2629_v55 }
 0x2fa   : > { %v1835_v53 = vpop.eup %1834 }
 0x2fb   : > { %v788_v0 = vmul.f32 %v1835_v53, %v783_v50  ;;  %v2721_v50 = vld [vmem:[%s3264_s1 + $0x1c8] sm:$0xff]  ;;  %v2727_v53 = vld [vmem:[%s3264_s1 + $0x1d8] sm:$0xff] }
 0x2fd   : > { %854 = vmatmul.mubr.f32.vlgmr.msra.gmra.mxu0 %v788_v0  ;;  %925 = vmatmul.mubr.f32.vlgmr.msra.gmra.mxu1 %v788_v0  ;;  %v2733_v0 = vld [vmem:[%s3264_s1 + $0x1c0] sm:$0xff] }
 0x2fe   : > { %959 = vmatpush1.msra.mxu0 %v2031_v2  ;;  %1030 = vmatpush1.msra.mxu1 %v2067_v9  ;;  %v3401_v2 = vld [vmem:[#allocation8_spill] sm:$0xff]  ;;  %v3406_v9 = vld [vmem:[#allocation9_spill] sm:$0xff] }
 0x2ff   : > { %960 = vmatprep.subr.mxu0 %v2036_v3  ;;  %1031 = vmatprep.subr.mxu1 %v2072_v10  ;;  %v3402_v3 = vld [vmem:[#allocation6_spill] sm:$0xff] }
 0x300   : > { %961 = vmatpush1.msra.mxu0 %v2042_v4  ;;  %1032 = vmatpush1.msra.mxu1 %v2084_v12  ;;  %v3403_v4 = vld [vmem:[#allocation10_spill] sm:$0xff]  ;;  %v3409_v12 = vld [vmem:[#allocation16_spill] sm:$0xff] }
 0x301   : > { %962 = vmatprep.subr.mxu0 %v2049_v6  ;;  %1033 = vmatprep.subr.mxu1 %v2096_v14  ;;  %v3404_v6 = vld [vmem:[#allocation7_spill] sm:$0xff]  ;;  %v3407_v10 = vld [vmem:[#allocation14_spill] sm:$0xff] }
 0x302   : > { %963 = vmatpush1.msra.mxu0 %v2061_v8  ;;  %1034 = vmatpush1.msra.mxu1 %v2101_v15  ;;  %v3405_v8 = vld [vmem:[#allocation12_spill] sm:$0xff]  ;;  %v3411_v14 = vld [vmem:[#allocation18_spill] sm:$0xff]  ;;  %v3412_v15 = vld [vmem:[#allocation15_spill] sm:$0xff] }
 0x303   : > { %964 = vmatprep.subr.mxu0 %v2078_v11  ;;  %1035 = vmatprep.subr.mxu1 %v2113_v17  ;;  %v3408_v11 = vld [vmem:[#allocation11_spill] sm:$0xff]  ;;  %v3414_v17 = vld [vmem:[#allocation17_spill] sm:$0xff] }
 0x304   : > { %965 = vmatpush1.msra.mxu0 %v2090_v13  ;;  %1036 = vmatpush1.msra.mxu1 %v2125_v19  ;;  %v3410_v13 = vld [vmem:[#allocation13_spill] sm:$0xff]  ;;  %v3416_v19 = vld [vmem:[#allocation19_spill] sm:$0xff] }
 0x305   : > { %966 = vmatprep.subr.mxu0 %v2107_v16  ;;  %1037 = vmatprep.subr.mxu1 %v2137_v21  ;;  %v3413_v16 = vld [vmem:[#allocation20_spill] sm:$0xff]  ;;  %v3418_v21 = vld [vmem:[#allocation21_spill] sm:$0xff] }
 0x306   : > { %967 = vmatpush1.msra.mxu0 %v2119_v18  ;;  %1038 = vmatpush1.msra.mxu1 %v2149_v23  ;;  %v3415_v18 = vld [vmem:[#allocation22_spill] sm:$0xff]  ;;  %v3420_v23 = vld [vmem:[#allocation24_spill] sm:$0xff] }
 0x307   : > { %968 = vmatprep.subr.mxu0 %v2131_v20  ;;  %1039 = vmatprep.subr.mxu1 %v2161_v25  ;;  %v3417_v20 = vld [vmem:[#allocation23_spill] sm:$0xff]  ;;  %v3422_v25 = vld [vmem:[#allocation5_spill] sm:$0xff] }
 0x308   : > { %969 = vmatpush1.msra.mxu0 %v2143_v22  ;;  %1040 = vmatpush1.msra.mxu1 %v2173_v27  ;;  %v3419_v22 = vmov 0.0  }
 0x309   : > { %970 = vmatprep.subr.mxu0 %v2155_v24  ;;  %1041 = vmatprep.subr.mxu1 %v2185_v29  ;;  %v3421_v24 = vld [vmem:[#allocation4_spill] sm:$0xff] }
 0x30a   : > { %971 = vmatpush1.msra.mxu0 %v2167_v26  ;;  %1042 = vmatpush1.msra.mxu1 %v2197_v31  ;;  %v1754_v26 = vld [vmem:[%s2020_s20 + $0x60] sm:$0xff] }
 0x30b   : > { %972 = vmatprep.subr.mxu0 %v2179_v28  ;;  %1043 = vmatprep.subr.mxu1 %v2209_v33  ;;  %v1755_v28 = vld [vmem:[%s2020_s20 + $0x68] sm:$0xff] }
 0x30c   : > { %973 = vmatpush1.msra.mxu0 %v2191_v30  ;;  %1044 = vmatpush1.msra.mxu1 %v2221_v35 }
 0x30d   : > { %974 = vmatprep.subr.mxu0 %v2203_v32  ;;  %1045 = vmatprep.subr.mxu1 %v2233_v37 }
 0x30e   : > { %975 = vmatpush1.msra.mxu0 %v2215_v34  ;;  %1046 = vmatpush1.msra.mxu1 %v2245_v39  ;;  %v1756_v34 = vld [vmem:[%s2020_s20 + $0x70] sm:$0xff] }
 0x30f   : > { %976 = vmatprep.subr.mxu0 %v2227_v36  ;;  %1047 = vmatprep.subr.mxu1 %v2257_v41 }
 0x310   : > { %977 = vmatpush1.msra.mxu0 %v2239_v38  ;;  %1048 = vmatpush1.msra.mxu1 %v2269_v43  ;;  %v1757_v38 = vld [vmem:[%s2020_s20 + $0x78] sm:$0xff] }
 0x311   : > { %978 = vmatprep.subr.mxu0 %v2251_v40  ;;  %1049 = vmatprep.subr.mxu1 %v2281_v45 }
 0x312   : > { %979 = vmatpush1.msra.mxu0 %v2263_v42  ;;  %1050 = vmatpush1.msra.mxu1 %v2293_v47 }
 0x313   : > { %980 = vmatprep.subr.mxu0 %v2275_v44  ;;  %1051 = vmatprep.subr.mxu1 %v3401_v2 }
 0x314   : > { %981 = vmatpush1.msra.mxu0 %v3402_v3  ;;  %1052 = vmatpush1.msra.mxu1 %v3403_v4 }
 0x315   : > { %982 = vmatprep.subr.mxu0 %v3404_v6  ;;  %1053 = vmatprep.subr.mxu1 %v3405_v8 }
 0x316   : > { %983 = vmatpush1.msra.mxu0 %v3406_v9  ;;  %1054 = vmatpush1.msra.mxu1 %v3407_v10 }
 0x317   : > { %984 = vmatprep.subr.mxu0 %v3408_v11  ;;  %1055 = vmatprep.subr.mxu1 %v3409_v12 }
 0x318   : > { %985 = vmatpush1.msra.mxu0 %v3410_v13  ;;  %1056 = vmatpush1.msra.mxu1 %v3411_v14 }
 0x319   : > { %986 = vmatprep.subr.mxu0 %v3412_v15  ;;  %1057 = vmatprep.subr.mxu1 %v3413_v16 }
 0x31a   : > { %987 = vmatpush1.msra.mxu0 %v3414_v17  ;;  %1058 = vmatpush1.msra.mxu1 %v3415_v18 }
 0x31b   : > { %988 = vmatprep.subr.mxu0 %v3416_v19  ;;  %1059 = vmatprep.subr.mxu1 %v3417_v20 }
 0x31c   : > { %989 = vmatpush1.msra.mxu0 %v3418_v21  ;;  %1022 = vmatprep.mubr.f32.mxu0 %v3419_v22 }
 0x31d   : > { %1060 = vmatpush1.msra.mxu1 %v3420_v23  ;;  %1093 = vmatprep.mubr.f32.mxu1 %v3419_v22 }
 0x31e   : > { %1127 = vmatprep.subr.mxu0 %v3421_v24  ;;  %1198 = vmatprep.subr.mxu1 %v3422_v25  ;;  %v2739_v24 = vld [vmem:[%s3264_s1 + $0x1d0] sm:$0xff]  ;;  %v2745_v25 = vld [vmem:[%s3264_s1 + $0x1a8] sm:$0xff] }
 0x3bd   : > { %v855_v27 = vpop.f32.mrf.mxu0  ;;  %v926_v33 = vpop.f32.mrf.mxu1 }
 0x3be   : > { %v936_v29 = vadd.f32 %v1754_v26, %v855_v27  ;;  %v938_v36 = vadd.f32 %v1756_v34, %v926_v33  ;;  %v2751_v26 = vld [vmem:[%s3264_s1 + $0x1b8] sm:$0xff]  ;;  %v2757_v27 = vld [vmem:[%s3264_s1 + $0x1a0] sm:$0xff]  ;;  %v2793_v33 = vld [vmem:[%s3264_s1 + $0x168] sm:$0xff] }
 0x3bf   : > { %v857_v30 = vpop.f32.mrf.mxu0  ;;  %v928_v37 = vpop.f32.mrf.mxu1  ;;  %v2799_v34 = vld [vmem:[%s3264_s1 + $0x178] sm:$0xff] }
 0x3c0   : > { %v940_v31 = vmul.f32 0.5, %v936_v29  ;;  %v937_v32 = vadd.f32 %v1755_v28, %v857_v30  ;;  %v939_v40 = vadd.f32 %v1757_v38, %v928_v37  ;;  %v2763_v28 = vld [vmem:[%s3264_s1 + $0x1b0] sm:$0xff]  ;;  %v2769_v29 = vld [vmem:[%s3264_s1 + $0x188] sm:$0xff]  ;;  %v2775_v30 = vld [vmem:[%s3264_s1 + $0x198] sm:$0xff] }
 0x3c1   : > { %v2817_v37 = vld [vmem:[%s3264_s1 + $0x148] sm:$0xff]  ;;  %v2823_v38 = vld [vmem:[%s3264_s1 + $0x158] sm:$0xff] }
 0x3c2   : > { %1836 = vtanh.f32 %v940_v31  ;;  %v944_v35 = vmul.f32 0.5, %v937_v32  ;;  %v949_v59 = vmul.f32 0.5, %v939_v40  ;;  %v2781_v31 = vld [vmem:[%s3264_s1 + $0x180] sm:$0xff]  ;;  %v2787_v32 = vld [vmem:[%s3264_s1 + $0x190] sm:$0xff] }
 0x3c3   : > { %v2829_v40 = vld [vmem:[%s3264_s1 + $0x140] sm:$0xff] }
 0x3c4   : > { %1838 = vtanh.f32 %v944_v35  ;;  %v2805_v35 = vld [vmem:[%s3264_s1 + $0x160] sm:$0xff] }
 0x3c5   : > { %1840 = vtanh.f32 %v938_v36  ;;  %v2811_v36 = vld [vmem:[%s3264_s1 + $0x170] sm:$0xff] }
 0x3c6   : > { %1842 = vtanh.f32 %v949_v59  ;;  %v2835_v59 = vld [vmem:[%s3264_s1 + $0x150] sm:$0xff] }
 0x3cf   : > { %v1837_v54 = vpop.eup %1836 }
 0x3d0   : > { %v942_v7 = vmul.f32 0.5, %v1837_v54  ;;  %v2841_v54 = vld [vmem:[%s3264_s1 + $0x128] sm:$0xff] }
 0x3d1   : > { %v1839_v46 = vpop.eup %1838 }
 0x3d2   : > { %v943_v48 = vadd.f32 0.5, %v942_v7  ;;  %v946_v49 = vmul.f32 0.5, %v1839_v46  ;;  %v1841_v57 = vpop.eup %1840  ;;  %v2847_v7 = vld [vmem:[%s3264_s1 + $0x138] sm:$0xff]  ;;  %v2853_v46 = vld [vmem:[%s3264_s1 + $0x120] sm:$0xff] }
 0x3d3   : > { %v1843_v62 = vpop.eup %1842 }
 0x3d4   : > { %v947_v60 = vadd.f32 0.5, %v946_v49  ;;  %v954_v5 = vmul.f32 %v1841_v57, %v943_v48  ;;  %v951_v63 = vmul.f32 0.5, %v1843_v62  ;;  %v2859_v48 = vld [vmem:[%s3264_s1 + $0x130] sm:$0xff]  ;;  %v2865_v49 = vld [vmem:[%s3264_s1 + $0x108] sm:$0xff]  ;;  %v2877_v57 = vld [vmem:[%s3264_s1 + $0x100] sm:$0xff] }
 0x3d5   : > { %v2895_v62 = vld [vmem:[%s3264_s1 + $0xf8] sm:$0xff] }
 0x3d6   : > { %v953_v51 = vmul.f32 %v947_v60, %v2629_v55  ;;  %v952_v56 = vadd.f32 0.5, %v951_v63  ;;  %v2715_v55 = vld [vmem:[%s3264_s1 + $0x1f0] sm:$0xff]  ;;  %v2871_v60 = vld [vmem:[%s3264_s1 + $0x118] sm:$0xff]  ;;  %v2901_v63 = vld [vmem:[%s3264_s1 + $0xe0] sm:$0xff] }
 0x3d8   : > { %v2703_v58 = vadd.f32 %v954_v5, %v953_v51  ;;  %v2883_v51 = vld [vmem:[%s3264_s1 + $0x110] sm:$0xff]  ;;  %v2889_v5 = vld [vmem:[%s3264_s1 + $0xe8] sm:$0xff] }
 0x3da   : > { %1844 = vtanh.f32 %v2703_v58 }
 0x3e7   : > { %v1845_v1 = vpop.eup %1844 }
 0x3e8   : > { %v957_v61 = vmul.f32 %v1845_v1, %v952_v56  ;;  %v2908_v56 = vld [vmem:[%s3264_s1 + $0xc8] sm:$0xff]  ;;  %v2915_v1 = vld [vmem:[%s3264_s1 + $0xc0] sm:$0xff] }
 0x3ea   : > { %1023 = vmatmul.mubr.f32.vlgmr.msra.gmra.mxu0 %v957_v61  ;;  %1094 = vmatmul.mubr.f32.vlgmr.msra.gmra.mxu1 %v957_v61 }
 0x3eb   : > { %1128 = vmatpush1.msra.mxu0 %v2709_v52  ;;  %1199 = vmatpush1.msra.mxu1 %v2715_v55 }
 0x3ec   : > { %1129 = vmatprep.subr.mxu0 %v2721_v50  ;;  %1200 = vmatprep.subr.mxu1 %v2727_v53 }
 0x3ed   : > { %1130 = vmatpush1.msra.mxu0 %v2733_v0  ;;  %1201 = vmatpush1.msra.mxu1 %v2739_v24 }
 0x3ee   : > { %1131 = vmatprep.subr.mxu0 %v2745_v25  ;;  %1202 = vmatprep.subr.mxu1 %v2751_v26 }
 0x3ef   : > { %1132 = vmatpush1.msra.mxu0 %v2757_v27  ;;  %1203 = vmatpush1.msra.mxu1 %v2763_v28 }
 0x3f0   : > { %1133 = vmatprep.subr.mxu0 %v2769_v29  ;;  %1204 = vmatprep.subr.mxu1 %v2775_v30 }
 0x3f1   : > { %1134 = vmatpush1.msra.mxu0 %v2781_v31  ;;  %1205 = vmatpush1.msra.mxu1 %v2787_v32 }
 0x3f2   : > { %1135 = vmatprep.subr.mxu0 %v2793_v33  ;;  %1206 = vmatprep.subr.mxu1 %v2799_v34 }
 0x3f3   : > { %1136 = vmatpush1.msra.mxu0 %v2805_v35  ;;  %1207 = vmatpush1.msra.mxu1 %v2811_v36 }
 0x3f4   : > { %1137 = vmatprep.subr.mxu0 %v2817_v37  ;;  %1208 = vmatprep.subr.mxu1 %v2823_v38 }
 0x3f5   : > { %1138 = vmatpush1.msra.mxu0 %v2829_v40  ;;  %1209 = vmatpush1.msra.mxu1 %v2835_v59 }
 0x3f6   : > { %1139 = vmatprep.subr.mxu0 %v2841_v54  ;;  %1210 = vmatprep.subr.mxu1 %v2847_v7 }
 0x3f7   : > { %1140 = vmatpush1.msra.mxu0 %v2853_v46  ;;  %1211 = vmatpush1.msra.mxu1 %v2859_v48 }
 0x3f8   : > { %1141 = vmatprep.subr.mxu0 %v2865_v49  ;;  %1212 = vmatprep.subr.mxu1 %v2871_v60 }
 0x3f9   : > { %1142 = vmatpush1.msra.mxu0 %v2877_v57  ;;  %1213 = vmatpush1.msra.mxu1 %v2883_v51 }
 0x3fa   : > { %1143 = vmatprep.subr.mxu0 %v2889_v5  ;;  %1214 = vmatprep.subr.mxu1 %v2895_v62 }
 0x3fb   : > { %1144 = vmatpush1.msra.mxu0 %v2901_v63  ;;  %1215 = vmatpush1.msra.mxu1 %v2245_v39  ;;  %v2922_v39 = vld [vmem:[%s3264_s1 + $0xa8] sm:$0xff] }
 0x3fc   : > { %1145 = vmatprep.subr.mxu0 %v2908_v56  ;;  %1216 = vmatprep.subr.mxu1 %v2257_v41  ;;  %v2953_v41 = vld [vmem:[%s3264_s1 + $0x1e8] sm:$0xff] }
 0x3fd   : > { %1146 = vmatpush1.msra.mxu0 %v2915_v1  ;;  %1217 = vmatpush1.msra.mxu1 %v2269_v43  ;;  %v1758_v43 = vld [vmem:[%s2020_s20 + $0x80] sm:$0xff] }
 0x3fe   : > { %1147 = vmatprep.subr.mxu0 %v2922_v39  ;;  %1218 = vmatprep.subr.mxu1 %v2281_v45  ;;  %v1759_v45 = vld [vmem:[%s2020_s20 + $0x88] sm:$0xff] }
 0x3ff   : > { %1148 = vmatpush1.msra.mxu0 %v2263_v42  ;;  %1219 = vmatpush1.msra.mxu1 %v2293_v47  ;;  %v2959_v42 = vld [vmem:[%s3264_s1 + $0x1f8] sm:$0xff] }
 0x400   : > { %1149 = vmatprep.subr.mxu0 %v2275_v44  ;;  %1220 = vmatprep.subr.mxu1 %v3401_v2 }
 0x401   : > { %1150 = vmatpush1.msra.mxu0 %v3402_v3  ;;  %1221 = vmatpush1.msra.mxu1 %v3403_v4 }
 0x402   : > { %1151 = vmatprep.subr.mxu0 %v3404_v6  ;;  %1222 = vmatprep.subr.mxu1 %v3405_v8  ;;  %v1760_v8 = vld [vmem:[%s2020_s20 + $0x90] sm:$0xff] }
 0x403   : > { %1152 = vmatpush1.msra.mxu0 %v3406_v9  ;;  %1223 = vmatpush1.msra.mxu1 %v3407_v10 }
 0x404   : > { %1153 = vmatprep.subr.mxu0 %v3408_v11  ;;  %1224 = vmatprep.subr.mxu1 %v3409_v12  ;;  %v1761_v12 = vld [vmem:[%s2020_s20 + $0x98] sm:$0xff] }
 0x405   : > { %1154 = vmatpush1.msra.mxu0 %v3410_v13  ;;  %1225 = vmatpush1.msra.mxu1 %v3411_v14 }
 0x406   : > { %1155 = vmatprep.subr.mxu0 %v3412_v15  ;;  %1226 = vmatprep.subr.mxu1 %v3413_v16 }
 0x407   : > { %1156 = vmatpush1.msra.mxu0 %v3414_v17  ;;  %1227 = vmatpush1.msra.mxu1 %v3415_v18 }
 0x408   : > { %1157 = vmatprep.subr.mxu0 %v3416_v19  ;;  %1228 = vmatprep.subr.mxu1 %v3417_v20 }
 0x409   : > { %1158 = vmatpush1.msra.mxu0 %v3418_v21  ;;  %1191 = vmatprep.mubr.f32.mxu0 %v3419_v22 }
 0x40a   : > { %1229 = vmatpush1.msra.mxu1 %v3420_v23  ;;  %1262 = vmatprep.mubr.f32.mxu1 %v3419_v22 }
 0x40b   : > { %1296 = vmatprep.subr.mxu0 %v2953_v41  ;;  %1367 = vmatprep.subr.mxu1 %v2959_v42 }
 0x4aa   : > { %v1024_v44 = vpop.f32.mrf.mxu0  ;;  %v1095_v6 = vpop.f32.mrf.mxu1 }
 0x4ab   : > { %v1105_v47 = vadd.f32 %v1758_v43, %v1024_v44  ;;  %v1107_v10 = vadd.f32 %v1760_v8, %v1095_v6  ;;  %v3020_v6 = vld [vmem:[%s3264_s1 + $0xd0] sm:$0xff]  ;;  %v3027_v8 = vld [vmem:[%s3264_s1 + $0xb8] sm:$0xff] }
 0x4ac   : > { %v1026_v2 = vpop.f32.mrf.mxu0  ;;  %v1097_v11 = vpop.f32.mrf.mxu1 }
 0x4ad   : > { %v1109_v3 = vmul.f32 0.5, %v1105_v47  ;;  %v1106_v4 = vadd.f32 %v1759_v45, %v1026_v2  ;;  %v1108_v13 = vadd.f32 %v1761_v12, %v1097_v11  ;;  %v3045_v11 = vld [vmem:[%s3264_s1 + $0x88] sm:$0xff]  ;;  %v3051_v12 = vld [vmem:[%s3264_s1 + $0x98] sm:$0xff] }
 0x4ae   : > { %3423 = vst [vmem:[#allocation8_spill] sm:$0xff] %v3051_v12 }
 0x4af   : > { %1846 = vtanh.f32 %v1109_v3  ;;  %v1113_v9 = vmul.f32 0.5, %v1106_v4  ;;  %v1118_v14 = vmul.f32 0.5, %v1108_v13  ;;  %v3013_v4 = vld [vmem:[%s3264_s1 + $0xd8] sm:$0xff]  ;;  %v3057_v13 = vld [vmem:[%s3264_s1 + $0x80] sm:$0xff] }
 0x4b0   : > { %3424 = vst [vmem:[#allocation6_spill] sm:$0xff] %v3057_v13 }
 0x4b1   : > { %1848 = vtanh.f32 %v1113_v9  ;;  %v3033_v9 = vld [vmem:[%s3264_s1 + $0xa0] sm:$0xff] }
 0x4b2   : > { %1850 = vtanh.f32 %v1107_v10  ;;  %v3039_v10 = vld [vmem:[%s3264_s1 + $0xb0] sm:$0xff] }
 0x4b3   : > { %1852 = vtanh.f32 %v1118_v14  ;;  %v3063_v14 = vld [vmem:[%s3264_s1 + $0x90] sm:$0xff] }
 0x4b4   : > { %3425 = vst [vmem:[#allocation10_spill] sm:$0xff] %v3063_v14 }
 0x4bc   : > { %v1847_v15 = vpop.eup %1846 }
 0x4bd   : > { %v1111_v16 = vmul.f32 0.5, %v1847_v15  ;;  %v3069_v15 = vld [vmem:[%s3264_s1 + $0x68] sm:$0xff] }
 0x4be   : > { %v1849_v17 = vpop.eup %1848  ;;  %3426 = vst [vmem:[#allocation7_spill] sm:$0xff] %v3069_v15 }
 0x4bf   : > { %v1112_v18 = vadd.f32 0.5, %v1111_v16  ;;  %v1115_v19 = vmul.f32 0.5, %v1849_v17  ;;  %v1851_v21 = vpop.eup %1850  ;;  %v3075_v16 = vld [vmem:[%s3264_s1 + $0x78] sm:$0xff]  ;;  %v3081_v17 = vld [vmem:[%s3264_s1 + $0x60] sm:$0xff] }
 0x4c0   : > { %v1853_v44 = vpop.eup %1852  ;;  %3427 = vst [vmem:[#allocation12_spill] sm:$0xff] %v3075_v16  ;;  %3428 = vst [vmem:[#allocation9_spill] sm:$0xff] %v3081_v17 }
 0x4c1   : > { %v1116_v20 = vadd.f32 0.5, %v1115_v19  ;;  %v1123_v61 = vmul.f32 %v1851_v21, %v1112_v18  ;;  %v1120_v45 = vmul.f32 0.5, %v1853_v44  ;;  %v3087_v18 = vld [vmem:[%s3264_s1 + $0x70] sm:$0xff]  ;;  %v3093_v19 = vld [vmem:[%s3264_s1 + $0x48] sm:$0xff]  ;;  %v3105_v21 = vld [vmem:[%s3264_s1 + $0x40] sm:$0xff] }
 0x4c2   : > { %3429 = vst [vmem:[#allocation14_spill] sm:$0xff] %v3087_v18  ;;  %3430 = vst [vmem:[#allocation11_spill] sm:$0xff] %v3093_v19  ;;  %v3123_v44 = vld [vmem:[%s3264_s1 + $0x38] sm:$0xff] }
 0x4c3   : > { %v1122_v23 = vmul.f32 %v1116_v20, %v2703_v58  ;;  %v1121_v47 = vadd.f32 0.5, %v1120_v45  ;;  %v3006_v58 = vld [vmem:[%s3264_s1 + $0xf0] sm:$0xff]  ;;  %v3099_v20 = vld [vmem:[%s3264_s1 + $0x58] sm:$0xff]  ;;  %3432 = vst [vmem:[#allocation13_spill] sm:$0xff] %v3105_v21  ;;  %3435 = vst [vmem:[#allocation20_spill] sm:$0xff] %v3123_v44 }
 0x4c4   : > { %3431 = vst [vmem:[#allocation16_spill] sm:$0xff] %v3099_v20  ;;  %v3129_v45 = vld [vmem:[%s3264_s1 + $0x20] sm:$0xff] }
 0x4c5   : > { %v2967_v43 = vadd.f32 %v1123_v61, %v1122_v23  ;;  %v3111_v23 = vld [vmem:[%s3264_s1 + $0x50] sm:$0xff]  ;;  %v3117_v61 = vld [vmem:[%s3264_s1 + $0x28] sm:$0xff]  ;;  %3436 = vst [vmem:[#allocation17_spill] sm:$0xff] %v3129_v45 }
 0x4c6   : > { %3433 = vst [vmem:[#allocation18_spill] sm:$0xff] %v3111_v23  ;;  %3434 = vst [vmem:[#allocation15_spill] sm:$0xff] %v3117_v61 }
 0x4c7   : > { %1854 = vtanh.f32 %v2967_v43 }
 0x4d4   : > { %v1855_v2 = vpop.eup %1854 }
 0x4d5   : > { %v1126_v3 = vmul.f32 %v1855_v2, %v1121_v47  ;;  %v3135_v47 = vld [vmem:[%s3264_s1 + $0x30] sm:$0xff]  ;;  %v3141_v2 = vld [vmem:[%s3264_s1 + $0x8] sm:$0xff] }
 0x4d6   : > { %3437 = vst [vmem:[#allocation22_spill] sm:$0xff] %v3135_v47  ;;  %3438 = vst [vmem:[#allocation19_spill] sm:$0xff] %v3141_v2 }
 0x4d7   : > { %1192 = vmatmul.mubr.f32.vlgmr.msra.gmra.mxu0 %v1126_v3  ;;  %1263 = vmatmul.mubr.f32.vlgmr.msra.gmra.mxu1 %v1126_v3  ;;  %v3147_v3 = vld [vmem:[%s3264_s1 + $0x18] sm:$0xff] }
 0x4d8   : > { %1297 = vmatpush1.msra.mxu0 %v2709_v52  ;;  %1368 = vmatpush1.msra.mxu1 %v2715_v55  ;;  %3439 = vst [vmem:[#allocation23_spill] sm:$0xff] %v3147_v3 }
 0x4d9   : > { %1298 = vmatprep.subr.mxu0 %v2721_v50  ;;  %1369 = vmatprep.subr.mxu1 %v2727_v53 }
 0x4da   : > { %1299 = vmatpush1.msra.mxu0 %v2733_v0  ;;  %1370 = vmatpush1.msra.mxu1 %v2739_v24 }
 0x4db   : > { %1300 = vmatprep.subr.mxu0 %v2745_v25  ;;  %1371 = vmatprep.subr.mxu1 %v2751_v26 }
 0x4dc   : > { %1301 = vmatpush1.msra.mxu0 %v2757_v27  ;;  %1372 = vmatpush1.msra.mxu1 %v2763_v28 }
 0x4dd   : > { %1302 = vmatprep.subr.mxu0 %v2769_v29  ;;  %1373 = vmatprep.subr.mxu1 %v2775_v30 }
 0x4de   : > { %1303 = vmatpush1.msra.mxu0 %v2781_v31  ;;  %1374 = vmatpush1.msra.mxu1 %v2787_v32 }
 0x4df   : > { %1304 = vmatprep.subr.mxu0 %v2793_v33  ;;  %1375 = vmatprep.subr.mxu1 %v2799_v34 }
 0x4e0   : > { %1305 = vmatpush1.msra.mxu0 %v2805_v35  ;;  %1376 = vmatpush1.msra.mxu1 %v2811_v36 }
 0x4e1   : > { %1306 = vmatprep.subr.mxu0 %v2817_v37  ;;  %1377 = vmatprep.subr.mxu1 %v2823_v38 }
 0x4e2   : > { %1307 = vmatpush1.msra.mxu0 %v2829_v40  ;;  %1378 = vmatpush1.msra.mxu1 %v2835_v59 }
 0x4e3   : > { %1308 = vmatprep.subr.mxu0 %v2841_v54  ;;  %1379 = vmatprep.subr.mxu1 %v2847_v7 }
 0x4e4   : > { %1309 = vmatpush1.msra.mxu0 %v2853_v46  ;;  %1380 = vmatpush1.msra.mxu1 %v2859_v48 }
 0x4e5   : > { %1310 = vmatprep.subr.mxu0 %v2865_v49  ;;  %1381 = vmatprep.subr.mxu1 %v2871_v60 }
 0x4e6   : > { %1311 = vmatpush1.msra.mxu0 %v2877_v57  ;;  %1382 = vmatpush1.msra.mxu1 %v2883_v51 }
 0x4e7   : > { %1312 = vmatprep.subr.mxu0 %v2889_v5  ;;  %1383 = vmatprep.subr.mxu1 %v2895_v62 }
 0x4e8   : > { %1313 = vmatpush1.msra.mxu0 %v2901_v63  ;;  %1384 = vmatpush1.msra.mxu1 %v3006_v58 }
 0x4e9   : > { %1314 = vmatprep.subr.mxu0 %v2908_v56  ;;  %1385 = vmatprep.subr.mxu1 %v3013_v4 }
 0x4ea   : > { %1315 = vmatpush1.msra.mxu0 %v2915_v1  ;;  %1386 = vmatpush1.msra.mxu1 %v3020_v6 }
 0x4eb   : > { %1316 = vmatprep.subr.mxu0 %v2922_v39  ;;  %1387 = vmatprep.subr.mxu1 %v3027_v8 }
 0x4ec   : > { %1317 = vmatpush1.msra.mxu0 %v3033_v9  ;;  %1388 = vmatpush1.msra.mxu1 %v3039_v10 }
 0x4ed   : > { %1318 = vmatprep.subr.mxu0 %v3045_v11  ;;  %1389 = vmatprep.subr.mxu1 %v3051_v12 }
 0x4ee   : > { %1319 = vmatpush1.msra.mxu0 %v3057_v13  ;;  %1390 = vmatpush1.msra.mxu1 %v3063_v14 }
 0x4ef   : > { %1320 = vmatprep.subr.mxu0 %v3069_v15  ;;  %1391 = vmatprep.subr.mxu1 %v3075_v16 }
 0x4f0   : > { %1321 = vmatpush1.msra.mxu0 %v3081_v17  ;;  %1392 = vmatpush1.msra.mxu1 %v3087_v18 }
 0x4f1   : > { %1322 = vmatprep.subr.mxu0 %v3093_v19  ;;  %1393 = vmatprep.subr.mxu1 %v3099_v20  ;;  %v1764_v19 = vld [vmem:[%s2020_s20 + $0xb0] sm:$0xff] }
 0x4f2   : > { %1323 = vmatpush1.msra.mxu0 %v3105_v21  ;;  %1394 = vmatpush1.msra.mxu1 %v3111_v23 }
 0x4f3   : > { %1324 = vmatprep.subr.mxu0 %v3117_v61  ;;  %1395 = vmatprep.subr.mxu1 %v3123_v44  ;;  %v1763_v44 = vld [vmem:[%s2020_s20 + $0xa8] sm:$0xff] }
 0x4f4   : > { %1325 = vmatpush1.msra.mxu0 %v3129_v45  ;;  %1396 = vmatpush1.msra.mxu1 %v3135_v47  ;;  %v3153_v45 = vld [vmem:[%s3264_s1] sm:$0xff] }
 0x4f5   : > { %1326 = vmatprep.subr.mxu0 %v3141_v2  ;;  %1397 = vmatprep.subr.mxu1 %v3147_v3  ;;  %3440 = vst [vmem:[#allocation21_spill] sm:$0xff] %v3153_v45  ;;  %v3160_v2 = vld [vmem:[%s3264_s1 + $0x10] sm:$0xff]  ;;  %v1762_v3 = vld [vmem:[%s2020_s20 + $0xa0] sm:$0xff] }
 0x4f6   : > { %1327 = vmatpush1.msra.mxu0 %v3153_v45  ;;  %1360 = vmatprep.mubr.f32.mxu0 %v3419_v22  ;;  %3441 = vst [vmem:[#allocation24_spill] sm:$0xff] %v3160_v2 }
 0x4f7   : > { %1398 = vmatpush1.msra.mxu1 %v3160_v2  ;;  %1431 = vmatprep.mubr.f32.mxu1 %v3419_v22  ;;  %v1765_v22 = vld [vmem:[%s2020_s20 + $0xb8] sm:$0xff] }
 0x4f8   : > { %1465 = vmatprep.subr.mxu0 %v2953_v41  ;;  %1536 = vmatprep.subr.mxu1 %v2959_v42 }
 0x597   : > { %v1193_v47 = vpop.f32.mrf.mxu0  ;;  %v1264_v20 = vpop.f32.mrf.mxu1 }
 0x598   : > { %v1274_v45 = vadd.f32 %v1762_v3, %v1193_v47  ;;  %v1276_v17 = vadd.f32 %v1764_v19, %v1264_v20 }
 0x599   : > { %v1195_v61 = vpop.f32.mrf.mxu0  ;;  %v1266_v2 = vpop.f32.mrf.mxu1 }
 0x59a   : > { %v1278_v23 = vmul.f32 0.5, %v1274_v45  ;;  %v1275_v21 = vadd.f32 %v1763_v44, %v1195_v61  ;;  %v1277_v41 = vadd.f32 %v1765_v22, %v1266_v2  ;;  %v1770_v2 = vld [vmem:[%s2020_s20 + $0xe0] sm:$0xff] }
 0x59c   : > { %1856 = vtanh.f32 %v1278_v23  ;;  %v1282_v18 = vmul.f32 0.5, %v1275_v21  ;;  %v1287_v16 = vmul.f32 0.5, %v1277_v41  ;;  %v1771_v41 = vld [vmem:[%s2020_s20 + $0xe8] sm:$0xff] }
 0x59e   : > { %1858 = vtanh.f32 %v1282_v18 }
 0x59f   : > { %1860 = vtanh.f32 %v1276_v17 }
 0x5a0   : > { %1862 = vtanh.f32 %v1287_v16 }
 0x5a9   : > { %v1857_v15 = vpop.eup %1856 }
 0x5aa   : > { %v1280_v42 = vmul.f32 0.5, %v1857_v15 }
 0x5ab   : > { %v1859_v14 = vpop.eup %1858 }
 0x5ac   : > { %v1281_v13 = vadd.f32 0.5, %v1280_v42  ;;  %v1284_v12 = vmul.f32 0.5, %v1859_v14  ;;  %v1861_v45 = vpop.eup %1860 }
 0x5ad   : > { %v1863_v18 = vpop.eup %1862 }
 0x5ae   : > { %v1285_v47 = vadd.f32 0.5, %v1284_v12  ;;  %v1292_v44 = vmul.f32 %v1861_v45, %v1281_v13  ;;  %v1289_v19 = vmul.f32 0.5, %v1863_v18 }
 0x5b0   : > { %v1291_v61 = vmul.f32 %v1285_v47, %v2967_v43  ;;  %v1290_v17 = vadd.f32 0.5, %v1289_v19 }
 0x5b2   : > { %v3171_v23 = vadd.f32 %v1292_v44, %v1291_v61 }
 0x5b4   : > { %1864 = vtanh.f32 %v3171_v23 }
 0x5c1   : > { %v1865_v22 = vpop.eup %1864 }
 0x5c2   : > { %v1295_v20 = vmul.f32 %v1865_v22, %v1290_v17  ;;  %v1773_v22 = vld [vmem:[%s2020_s20 + $0xf8] sm:$0xff] }
 0x5c4   : > { %1361 = vmatmul.mubr.f32.vlgmr.msra.gmra.mxu0 %v1295_v20  ;;  %1432 = vmatmul.mubr.f32.vlgmr.msra.gmra.mxu1 %v1295_v20 }
 0x5c5   : > { %1466 = vmatpush1.msra.mxu0 %v2709_v52  ;;  %1537 = vmatpush1.msra.mxu1 %v2715_v55  ;;  %v3442_v52 = vld [vmem:[#allocation8_spill] sm:$0xff]  ;;  %v3443_v55 = vld [vmem:[#allocation6_spill] sm:$0xff] }
 0x5c6   : > { %1467 = vmatprep.subr.mxu0 %v2721_v50  ;;  %1538 = vmatprep.subr.mxu1 %v2727_v53  ;;  %v3444_v50 = vld [vmem:[#allocation10_spill] sm:$0xff]  ;;  %v3445_v53 = vld [vmem:[#allocation7_spill] sm:$0xff] }
 0x5c7   : > { %1468 = vmatpush1.msra.mxu0 %v2733_v0  ;;  %1539 = vmatpush1.msra.mxu1 %v2739_v24  ;;  %v3446_v0 = vld [vmem:[#allocation12_spill] sm:$0xff]  ;;  %v3447_v24 = vld [vmem:[#allocation9_spill] sm:$0xff] }
 0x5c8   : > { %1469 = vmatprep.subr.mxu0 %v2745_v25  ;;  %1540 = vmatprep.subr.mxu1 %v2751_v26  ;;  %v3448_v25 = vld [vmem:[#allocation14_spill] sm:$0xff]  ;;  %v3449_v26 = vld [vmem:[#allocation11_spill] sm:$0xff] }
 0x5c9   : > { %1470 = vmatpush1.msra.mxu0 %v2757_v27  ;;  %1541 = vmatpush1.msra.mxu1 %v2763_v28  ;;  %v3450_v27 = vld [vmem:[#allocation16_spill] sm:$0xff]  ;;  %v3451_v28 = vld [vmem:[#allocation13_spill] sm:$0xff] }
 0x5ca   : > { %1471 = vmatprep.subr.mxu0 %v2769_v29  ;;  %1542 = vmatprep.subr.mxu1 %v2775_v30  ;;  %v3452_v29 = vld [vmem:[#allocation18_spill] sm:$0xff]  ;;  %v3453_v30 = vld [vmem:[#allocation15_spill] sm:$0xff] }
 0x5cb   : > { %1472 = vmatpush1.msra.mxu0 %v2781_v31  ;;  %1543 = vmatpush1.msra.mxu1 %v2787_v32  ;;  %v3454_v31 = vld [vmem:[#allocation20_spill] sm:$0xff]  ;;  %v3455_v32 = vld [vmem:[#allocation17_spill] sm:$0xff] }
 0x5cc   : > { %1473 = vmatprep.subr.mxu0 %v2793_v33  ;;  %1544 = vmatprep.subr.mxu1 %v2799_v34  ;;  %v3456_v33 = vld [vmem:[#allocation22_spill] sm:$0xff]  ;;  %v3457_v34 = vld [vmem:[#allocation19_spill] sm:$0xff] }
 0x5cd   : > { %1474 = vmatpush1.msra.mxu0 %v2805_v35  ;;  %1545 = vmatpush1.msra.mxu1 %v2811_v36  ;;  %v3458_v35 = vld [vmem:[#allocation23_spill] sm:$0xff]  ;;  %v3459_v36 = vld [vmem:[#allocation21_spill] sm:$0xff] }
 0x5ce   : > { %1475 = vmatprep.subr.mxu0 %v2817_v37  ;;  %1546 = vmatprep.subr.mxu1 %v2823_v38  ;;  %v3460_v37 = vmov 0.0   ;;  %v3461_v38 = vld [vmem:[#allocation24_spill] sm:$0xff] }
 0x5cf   : > { %1476 = vmatpush1.msra.mxu0 %v2829_v40  ;;  %1547 = vmatpush1.msra.mxu1 %v2835_v59  ;;  %v1766_v40 = vld [vmem:[%s2020_s20 + $0xc0] sm:$0xff] }
 0x5d0   : > { %1477 = vmatprep.subr.mxu0 %v2841_v54  ;;  %1548 = vmatprep.subr.mxu1 %v2847_v7  ;;  %v1767_v54 = vld [vmem:[%s2020_s20 + $0xc8] sm:$0xff] }
 0x5d1   : > { %1478 = vmatpush1.msra.mxu0 %v2853_v46  ;;  %1549 = vmatpush1.msra.mxu1 %v2859_v48 }
 0x5d2   : > { %1479 = vmatprep.subr.mxu0 %v2865_v49  ;;  %1550 = vmatprep.subr.mxu1 %v2871_v60 }
 0x5d3   : > { %1480 = vmatpush1.msra.mxu0 %v2877_v57  ;;  %1551 = vmatpush1.msra.mxu1 %v2883_v51  ;;  %v1768_v57 = vld [vmem:[%s2020_s20 + $0xd0] sm:$0xff] }
 0x5d4   : > { %1481 = vmatprep.subr.mxu0 %v2889_v5  ;;  %1552 = vmatprep.subr.mxu1 %v2895_v62 }
 0x5d5   : > { %1482 = vmatpush1.msra.mxu0 %v2901_v63  ;;  %1553 = vmatpush1.msra.mxu1 %v3006_v58  ;;  %v1769_v63 = vld [vmem:[%s2020_s20 + $0xd8] sm:$0xff] }
 0x5d6   : > { %1483 = vmatprep.subr.mxu0 %v2908_v56  ;;  %1554 = vmatprep.subr.mxu1 %v3013_v4 }
 0x5d7   : > { %1484 = vmatpush1.msra.mxu0 %v2915_v1  ;;  %1555 = vmatpush1.msra.mxu1 %v3020_v6 }
 0x5d8   : > { %1485 = vmatprep.subr.mxu0 %v2922_v39  ;;  %1556 = vmatprep.subr.mxu1 %v3027_v8 }
 0x5d9   : > { %1486 = vmatpush1.msra.mxu0 %v3033_v9  ;;  %1557 = vmatpush1.msra.mxu1 %v3039_v10 }
 0x5da   : > { %1487 = vmatprep.subr.mxu0 %v3045_v11  ;;  %1558 = vmatprep.subr.mxu1 %v3442_v52 }
 0x5db   : > { %1488 = vmatpush1.msra.mxu0 %v3443_v55  ;;  %1559 = vmatpush1.msra.mxu1 %v3444_v50 }
 0x5dc   : > { %1489 = vmatprep.subr.mxu0 %v3445_v53  ;;  %1560 = vmatprep.subr.mxu1 %v3446_v0 }
 0x5dd   : > { %1490 = vmatpush1.msra.mxu0 %v3447_v24  ;;  %1561 = vmatpush1.msra.mxu1 %v3448_v25 }
 0x5de   : > { %1491 = vmatprep.subr.mxu0 %v3449_v26  ;;  %1562 = vmatprep.subr.mxu1 %v3450_v27 }
 0x5df   : > { %1492 = vmatpush1.msra.mxu0 %v3451_v28  ;;  %1563 = vmatpush1.msra.mxu1 %v3452_v29 }
 0x5e0   : > { %1493 = vmatprep.subr.mxu0 %v3453_v30  ;;  %1564 = vmatprep.subr.mxu1 %v3454_v31 }
 0x5e1   : > { %1494 = vmatpush1.msra.mxu0 %v3455_v32  ;;  %1565 = vmatpush1.msra.mxu1 %v3456_v33 }
 0x5e2   : > { %1495 = vmatprep.subr.mxu0 %v3457_v34  ;;  %1566 = vmatprep.subr.mxu1 %v3458_v35 }
 0x5e3   : > { %1496 = vmatpush1.msra.mxu0 %v3459_v36  ;;  %1529 = vmatprep.mubr.f32.mxu0 %v3460_v37 }
 0x5e4   : > { %1567 = vmatpush1.msra.mxu1 %v3461_v38  ;;  %1600 = vmatprep.mubr.f32.mxu1 %v3460_v37 }
 0x684   : > { %v1362_v59 = vpop.f32.mrf.mxu0  ;;  %v1433_v60 = vpop.f32.mrf.mxu1 }
 0x685   : > { %v1443_v7 = vadd.f32 %v1766_v40, %v1362_v59  ;;  %v1445_v5 = vadd.f32 %v1768_v57, %v1433_v60 }
 0x686   : > { %v1364_v46 = vpop.f32.mrf.mxu0  ;;  %v1435_v62 = vpop.f32.mrf.mxu1 }
 0x687   : > { %v1447_v48 = vmul.f32 0.5, %v1443_v7  ;;  %v1444_v49 = vadd.f32 %v1767_v54, %v1364_v46  ;;  %v1446_v56 = vadd.f32 %v1769_v63, %v1435_v62 }
 0x689   : > { %1866 = vtanh.f32 %v1447_v48  ;;  %v1451_v51 = vmul.f32 0.5, %v1444_v49  ;;  %v1456_v1 = vmul.f32 0.5, %v1446_v56 }
 0x68b   : > { %1868 = vtanh.f32 %v1451_v51 }
 0x68c   : > { %1870 = vtanh.f32 %v1445_v5 }
 0x68d   : > { %1872 = vtanh.f32 %v1456_v1 }
 0x696   : > { %v1867_v39 = vpop.eup %1866 }
 0x697   : > { %v1449_v43 = vmul.f32 0.5, %v1867_v39 }
 0x698   : > { %v1869_v58 = vpop.eup %1868 }
 0x699   : > { %v1450_v4 = vadd.f32 0.5, %v1449_v43  ;;  %v1453_v6 = vmul.f32 0.5, %v1869_v58  ;;  %v1871_v9 = vpop.eup %1870 }
 0x69a   : > { %v1873_v13 = vpop.eup %1872 }
 0x69b   : > { %v1454_v8 = vadd.f32 0.5, %v1453_v6  ;;  %v1461_v11 = vmul.f32 %v1871_v9, %v1450_v4  ;;  %v1458_v14 = vmul.f32 0.5, %v1873_v13 }
 0x69d   : > { %v1460_v10 = vmul.f32 %v1454_v8, %v3171_v23  ;;  %v1459_v15 = vadd.f32 0.5, %v1458_v14  ;;  %v1772_v23 = vld [vmem:[%s2020_s20 + $0xf0] sm:$0xff] }
 0x69f   : > { %v1462_v12 = vadd.f32 %v1461_v11, %v1460_v10 }
 0x6a1   : > { %1874 = vtanh.f32 %v1462_v12 }
 0x6ae   : > { %v1875_v16 = vpop.eup %1874 }
 0x6af   : > { %v1464_v21 = vmul.f32 %v1875_v16, %v1459_v15 }
 0x6b1   : > { %1530 = vmatmul.mubr.f32.vlgmr.msra.gmra.mxu0 %v1464_v21  ;;  %1601 = vmatmul.mubr.f32.vlgmr.msra.gmra.mxu1 %v1464_v21 }
 0x771   : > { %v1531_v3 = vpop.f32.mrf.mxu0  ;;  %v1602_v44 = vpop.f32.mrf.mxu1 }
 0x772   : > { %v1612_v42 = vadd.f32 %v1770_v2, %v1531_v3  ;;  %v1614_v19 = vadd.f32 %v1772_v23, %v1602_v44 }
 0x773   : > { %v1533_v47 = vpop.f32.mrf.mxu0  ;;  %v1604_v17 = vpop.f32.mrf.mxu1 }
 0x774   : > { %v1616_v45 = vmul.f32 0.5, %v1612_v42  ;;  %v1613_v61 = vadd.f32 %v1771_v41, %v1533_v47  ;;  %v1615_v20 = vadd.f32 %v1773_v22, %v1604_v17 }
 0x776   : > { %1876 = vtanh.f32 %v1616_v45  ;;  %v1620_v18 = vmul.f32 0.5, %v1613_v61  ;;  %v1625_v52 = vmul.f32 0.5, %v1615_v20 }
 0x778   : > { %1878 = vtanh.f32 %v1620_v18 }
 0x779   : > { %1880 = vtanh.f32 %v1614_v19 }
 0x77a   : > { %1882 = vtanh.f32 %v1625_v52 }
 0x783   : > { %v1877_v55 = vpop.eup %1876 }
 0x784   : > { %v1618_v50 = vmul.f32 0.5, %v1877_v55 }
 0x785   : > { %v1879_v53 = vpop.eup %1878 }
 0x786   : > { %v1619_v0 = vadd.f32 0.5, %v1618_v50  ;;  %v1622_v24 = vmul.f32 0.5, %v1879_v53  ;;  %v1881_v26 = vpop.eup %1880 }
 0x787   : > { %v1883_v30 = vpop.eup %1882 }
 0x788   : > { %v1623_v25 = vadd.f32 0.5, %v1622_v24  ;;  %v1630_v28 = vmul.f32 %v1881_v26, %v1619_v0  ;;  %v1627_v31 = vmul.f32 0.5, %v1883_v30 }
 0x78a   : > { %v1629_v27 = vmul.f32 %v1623_v25, %v1462_v12  ;;  %v1628_v32 = vadd.f32 0.5, %v1627_v31 }
 0x78c   : > { %v1631_v29 = vadd.f32 %v1630_v28, %v1629_v27 }
 0x78e   : > { %1884 = vtanh.f32 %v1631_v29  ;;  %1635 = vst [vmem:[#allocation3] sm:$0xff] %v1631_v29 }
 0x79a   : > { %1639 = sbr.rel (%p1774_p6) target bundleno = 1952 (0x7a0), region = 36 }
 0x79b   : > { %v1885_v33 = vpop.eup %1884 }
 0x79c   : > { %v1633_v34 = vmul.f32 %v1885_v33, %v1628_v32 }
 0x79e   : > { %1634 = vst [vmem:[#allocation2] sm:$0xff] %v1633_v34 }
 0x79f   : > { %1640 = vst [vmem:[%s3265_s2] sm:$0xff] %v1633_v34  ;;  %1641 = vst [vmem:[%s3266_s3] sm:$0xff] %v1631_v29 }
 0x7a0 PF: > { %s14_s14 = sadd.s32 1, %s1972_s14   ;;  %s3462_s12 = smov %s1968_s13 }
 0x7a1   : > { %p11_p7 = scmp.ge.s32.totalorder %s14_s14, 4   ;;  %s3463_s13 = smov %s3465_s15 }
 0x7a3   :  { %13 = sbr.rel (!%p11_p7) target bundleno = 2 (0x2), region = 85 }

</bundles_post_ra>
